<compile_context>
chip_gen: v7x
topology: tpu7x:2x2x1
jax: 0.10.0
libtpu: 0.0.40
codegen_flags: <defaults>
</compile_context>

<pallas_src>
import functools

import jax
import jax.numpy as jnp
from jax import lax
from jax.experimental import pallas as pl
from jax.experimental.pallas import tpu as pltpu


def _pick_tile(dim: int, cap: int, align: int) -> int:
    """Largest tile <= cap that is a multiple of `align`, else the full dim."""
    if dim <= cap:
        return dim
    tile = (cap // align) * align
    if tile <= 0 or tile >= dim:
        return dim
    return tile


def _loss_kernel(prenet_ref, postnet_ref, target_ref, mdur_ref, tdur_ref,
                 out_ref, acc_ref, *, n_rows, n_cols, n_dur, mel_weight,
                 duration_weight, dur_scale, needs_mask):
    i = pl.program_id(0)
    j = pl.program_id(1)

    @pl.when((i == 0) & (j == 0))
    def _init():
        acc_ref[0] = jnp.float32(0.0)
        acc_ref[1] = jnp.float32(0.0)

    target = target_ref[...].astype(jnp.float32)
    d_pre = prenet_ref[...].astype(jnp.float32) - target
    d_post = postnet_ref[...].astype(jnp.float32) - target

    if needs_mask:
        tr, tc = target.shape
        row = lax.broadcasted_iota(jnp.int32, (tr, tc), 0) + i * tr
        col = lax.broadcasted_iota(jnp.int32, (tr, tc), 1) + j * tc
        mask = (row < n_rows) & (col < n_cols)
        d_pre = jnp.where(mask, d_pre, 0.0)
        d_post = jnp.where(mask, d_post, 0.0)

    # |d| computed once; |d| + |d|^2 folded so there is a single cross-lane
    # reduce per tensor per grid step.
    a_pre = jnp.abs(d_pre)
    a_post = jnp.abs(d_post)
    acc_ref[0] += jnp.sum(a_pre + a_pre * a_pre)
    acc_ref[1] += jnp.sum(a_post + a_post * a_post)

    is_last = ((i == pl.num_programs(0) - 1)
               & (j == pl.num_programs(1) - 1))

    @pl.when(is_last)
    def _finalize():
        inv_n = mel_weight / float(n_rows * n_cols)
        out_ref[0] = acc_ref[0] * inv_n
        out_ref[1] = acc_ref[1] * inv_n
        # Duration MSE on the tiny resident (B, L) blocks, computed once.
        d_dur = (mdur_ref[...].astype(jnp.float32)
                 - tdur_ref[...].astype(jnp.float32)) * dur_scale
        out_ref[2] = (duration_weight / float(n_dur)) * jnp.sum(d_dur * d_dur)


def non_attentive_tacotron_loss(prenet_mels, postnet_mels, model_durations,
                                target_durations, target_mels, *,
                                sample_rate, hop_size, mel_weight,
                                duration_weight, row_tile=256, col_tile=512):
    assert prenet_mels.shape == postnet_mels.shape == target_mels.shape
    assert model_durations.shape == target_durations.shape

    b, n_mels, t = target_mels.shape
    r = b * n_mels
    pre2d = prenet_mels.reshape(r, t)
    post2d = postnet_mels.reshape(r, t)
    tgt2d = target_mels.reshape(r, t)

    tr = _pick_tile(r, row_tile, 8)      # sublane-aligned row tile
    tc = _pick_tile(t, col_tile, 128)    # lane-dense frame tile
    grid = ((r + tr - 1) // tr, (t + tc - 1) // tc)
    needs_mask = (r % tr != 0) or (t % tc != 0)

    db, dl = model_durations.shape

    kernel = functools.partial(
        _loss_kernel,
        n_rows=r, n_cols=t, n_dur=db * dl,
        mel_weight=float(mel_weight),
        duration_weight=float(duration_weight),
        dur_scale=float(hop_size) / float(sample_rate),
        needs_mask=needs_mask,
    )

    mel_spec = pl.BlockSpec((tr, tc), lambda i, j: (i, j))
    dur_spec = pl.BlockSpec((db, dl), lambda i, j: (0, 0))  # resident, tiny

    losses = pl.pallas_call(
        kernel,
        out_shape=jax.ShapeDtypeStruct((3,), jnp.float32),
        grid=grid,
        in_specs=[mel_spec, mel_spec, mel_spec, dur_spec, dur_spec],
        out_specs=pl.BlockSpec((3,), lambda i, j: (0,),
                               memory_space=pltpu.MemorySpace.SMEM),
        scratch_shapes=[pltpu.SMEM((2,), jnp.float32)],
        compiler_params=pltpu.CompilerParams(
            dimension_semantics=("arbitrary", "arbitrary")),
    )(pre2d, post2d, tgt2d, model_durations, target_durations)
    return losses[0], losses[1], losses[2]


def _reference(prenet_mels, postnet_mels, model_durations, target_durations,
               target_mels, *, sample_rate, hop_size, mel_weight,
               duration_weight):
    pre_l1 = jnp.mean(jnp.abs(prenet_mels - target_mels))
    pre_l2 = jnp.mean((prenet_mels - target_mels) ** 2)
    post_l1 = jnp.mean(jnp.abs(postnet_mels - target_mels))
    post_l2 = jnp.mean((postnet_mels - target_mels) ** 2)
    scale = hop_size / sample_rate
    dur_l2 = jnp.mean((model_durations * scale - target_durations * scale) ** 2)
    return (mel_weight * (pre_l1 + pre_l2),
            mel_weight * (post_l1 + post_l2),
            duration_weight * dur_l2)


if __name__ == "__main__":
    # Deterministic "module parameters" (would come from LossParams config).
    sample_rate = 22050
    hop_size = 256
    mel_weight = 1.0
    duration_weight = 2.0

    B, N_MELS, T = 2, 80, 300   # mel tensors: (batch, n_mels, frames)
    L = 24                      # durations: (batch, token_len)

    key = jax.random.PRNGKey(0)
    k1, k2, k3, k4, k5 = jax.random.split(key, 5)
    prenet_mels = jax.random.normal(k1, (B, N_MELS, T), dtype=jnp.float32)
    postnet_mels = jax.random.normal(k2, (B, N_MELS, T), dtype=jnp.float32)
    target_mels = jax.random.normal(k3, (B, N_MELS, T), dtype=jnp.float32)
    model_durations = jax.random.uniform(k4, (B, L), dtype=jnp.float32,
                                         minval=0.0, maxval=20.0)
    target_durations = jax.random.uniform(k5, (B, L), dtype=jnp.float32,
                                          minval=0.0, maxval=20.0)

    cfg = dict(sample_rate=sample_rate, hop_size=hop_size,
               mel_weight=mel_weight, duration_weight=duration_weight)

    ref = _reference(prenet_mels, postnet_mels, model_durations,
                     target_durations, target_mels, **cfg)

    # Default tiles (single full block at this small size).
    out_full = non_attentive_tacotron_loss(
        prenet_mels, postnet_mels, model_durations, target_durations,
        target_mels, **cfg)
    jax.block_until_ready(out_full)

    # Forced small tiles: exercises the multi-step grid, SMEM accumulation
    # and partial-tile masking path (160 % 64 != 0, 300 % 128 != 0).
    out_tiled = non_attentive_tacotron_loss(
        prenet_mels, postnet_mels, model_durations, target_durations,
        target_mels, row_tile=64, col_tile=128, **cfg)
    jax.block_until_ready(out_tiled)

    for out in (out_full, out_tiled):
        for got, want in zip(out, ref):
            assert jnp.allclose(got, want, rtol=1e-4, atol=1e-5), (got, want)

    print("KERNEL_OK")
</pallas_src>

<mosaic_0001>
module attributes {stable_mosaic.version = 11 : i64} {
  func.func @_loss_kernel(%arg0: i32, %arg1: i32, %arg2: memref<160x300xf32, #tpu.memory_space<vmem>>, %arg3: memref<160x300xf32, #tpu.memory_space<vmem>>, %arg4: memref<160x300xf32, #tpu.memory_space<vmem>>, %arg5: memref<2x24xf32, #tpu.memory_space<vmem>>, %arg6: memref<2x24xf32, #tpu.memory_space<vmem>>, %arg7: memref<3xf32, #tpu.memory_space<smem>>, %arg8: memref<2xf32, #tpu.memory_space<smem>>) attributes {dimension_semantics = [#tpu.dimension_semantics<arbitrary>, #tpu.dimension_semantics<arbitrary>], iteration_bounds = array<i64: 1, 1>, scalar_prefetch = 0 : i64, scratch_operands = 1 : i64, tpu.core_type = #tpu.core_type<tc>, window_params = [{transform_indices = @transform_0, window_bounds = array<i64: 160, 300>}, {transform_indices = @transform_1, window_bounds = array<i64: 160, 300>}, {transform_indices = @transform_2, window_bounds = array<i64: 160, 300>}, {pipeline_mode = #tpu.pipeline_mode<synchronous>, transform_indices = @transform_3, window_bounds = array<i64: 2, 24>}, {pipeline_mode = #tpu.pipeline_mode<synchronous>, transform_indices = @transform_4, window_bounds = array<i64: 2, 24>}, {transform_indices = @transform_5, window_bounds = array<i64: 3>}]} {
    %c0_i32 = arith.constant 0 : i32
    %0 = arith.cmpi eq, %arg0, %c0_i32 : i32
    %c0_i32_0 = arith.constant 0 : i32
    %1 = arith.cmpi eq, %arg1, %c0_i32_0 : i32
    %2 = arith.andi %0, %1 : i1
    %3 = arith.extui %2 : i1 to i32
    %c0_i32_1 = arith.constant 0 : i32
    %4 = arith.cmpi ne, %3, %c0_i32_1 : i32
    scf.if %4 {
      %cst_14 = arith.constant 0.000000e+00 : f32
      %c0_15 = arith.constant 0 : index
      %35 = memref.load %arg8[%c0_15] : memref<2xf32, #tpu.memory_space<smem>>
      memref.store %cst_14, %arg8[%c0_15] : memref<2xf32, #tpu.memory_space<smem>>
      %cst_16 = arith.constant 0.000000e+00 : f32
      %c1_17 = arith.constant 1 : index
      %36 = memref.load %arg8[%c1_17] : memref<2xf32, #tpu.memory_space<smem>>
      memref.store %cst_16, %arg8[%c1_17] : memref<2xf32, #tpu.memory_space<smem>>
    } else {
    }
    %c0 = arith.constant 0 : index
    %c0_2 = arith.constant 0 : index
    %5 = vector.load %arg4[%c0, %c0_2] : memref<160x300xf32, #tpu.memory_space<vmem>>, vector<160x300xf32>
    %c0_3 = arith.constant 0 : index
    %c0_4 = arith.constant 0 : index
    %6 = vector.load %arg2[%c0_3, %c0_4] : memref<160x300xf32, #tpu.memory_space<vmem>>, vector<160x300xf32>
    %7 = arith.subf %6, %5 : vector<160x300xf32>
    %c0_5 = arith.constant 0 : index
    %c0_6 = arith.constant 0 : index
    %8 = vector.load %arg3[%c0_5, %c0_6] : memref<160x300xf32, #tpu.memory_space<vmem>>, vector<160x300xf32>
    %9 = arith.subf %8, %5 : vector<160x300xf32>
    %10 = math.absf %7 : vector<160x300xf32>
    %11 = math.absf %9 : vector<160x300xf32>
    %c0_7 = arith.constant 0 : index
    %12 = memref.load %arg8[%c0_7] : memref<2xf32, #tpu.memory_space<smem>>
    %13 = arith.mulf %10, %10 : vector<160x300xf32>
    %14 = arith.addf %10, %13 : vector<160x300xf32>
    %15 = vector.shape_cast %14 : vector<160x300xf32> to vector<1x160x300xf32>
    %cst = arith.constant dense<0.000000e+00> : vector<1xf32>
    %16 = vector.multi_reduction <add>, %15, %cst [1, 2] : vector<1x160x300xf32> to vector<1xf32>
    %17 = vector.shape_cast %16 : vector<1xf32> to vector<1x1x1xf32>
    %18 = vector.extract %17[0, 0, 0] : f32 from vector<1x1x1xf32>
    %19 = arith.addf %12, %18 : f32
    %c0_8 = arith.constant 0 : index
    %20 = memref.load %arg8[%c0_8] : memref<2xf32, #tpu.memory_space<smem>>
    memref.store %19, %arg8[%c0_8] : memref<2xf32, #tpu.memory_space<smem>>
    %c1 = arith.constant 1 : index
    %21 = memref.load %arg8[%c1] : memref<2xf32, #tpu.memory_space<smem>>
    %22 = arith.mulf %11, %11 : vector<160x300xf32>
    %23 = arith.addf %11, %22 : vector<160x300xf32>
    %24 = vector.shape_cast %23 : vector<160x300xf32> to vector<1x160x300xf32>
    %cst_9 = arith.constant dense<0.000000e+00> : vector<1xf32>
    %25 = vector.multi_reduction <add>, %24, %cst_9 [1, 2] : vector<1x160x300xf32> to vector<1xf32>
    %26 = vector.shape_cast %25 : vector<1xf32> to vector<1x1x1xf32>
    %27 = vector.extract %26[0, 0, 0] : f32 from vector<1x1x1xf32>
    %28 = arith.addf %21, %27 : f32
    %c1_10 = arith.constant 1 : index
    %29 = memref.load %arg8[%c1_10] : memref<2xf32, #tpu.memory_space<smem>>
    memref.store %28, %arg8[%c1_10] : memref<2xf32, #tpu.memory_space<smem>>
    %c0_i32_11 = arith.constant 0 : i32
    %30 = arith.cmpi eq, %arg0, %c0_i32_11 : i32
    %c0_i32_12 = arith.constant 0 : i32
    %31 = arith.cmpi eq, %arg1, %c0_i32_12 : i32
    %32 = arith.andi %30, %31 : i1
    %33 = arith.extui %32 : i1 to i32
    %c0_i32_13 = arith.constant 0 : i32
    %34 = arith.cmpi ne, %33, %c0_i32_13 : i32
    scf.if %34 {
      %c0_14 = arith.constant 0 : index
      %35 = memref.load %arg8[%c0_14] : memref<2xf32, #tpu.memory_space<smem>>
      %cst_15 = arith.constant 2.08333331E-5 : f32
      %36 = arith.mulf %35, %cst_15 : f32
      %c0_16 = arith.constant 0 : index
      %37 = memref.load %arg7[%c0_16] : memref<3xf32, #tpu.memory_space<smem>>
      memref.store %36, %arg7[%c0_16] : memref<3xf32, #tpu.memory_space<smem>>
      %c1_17 = arith.constant 1 : index
      %38 = memref.load %arg8[%c1_17] : memref<2xf32, #tpu.memory_space<smem>>
      %cst_18 = arith.constant 2.08333331E-5 : f32
      %39 = arith.mulf %38, %cst_18 : f32
      %c1_19 = arith.constant 1 : index
      %40 = memref.load %arg7[%c1_19] : memref<3xf32, #tpu.memory_space<smem>>
      memref.store %39, %arg7[%c1_19] : memref<3xf32, #tpu.memory_space<smem>>
      %c0_20 = arith.constant 0 : index
      %c0_21 = arith.constant 0 : index
      %41 = vector.load %arg5[%c0_20, %c0_21] : memref<2x24xf32, #tpu.memory_space<vmem>>, vector<2x24xf32>
      %c0_22 = arith.constant 0 : index
      %c0_23 = arith.constant 0 : index
      %42 = vector.load %arg6[%c0_22, %c0_23] : memref<2x24xf32, #tpu.memory_space<vmem>>, vector<2x24xf32>
      %43 = arith.subf %41, %42 : vector<2x24xf32>
      %cst_24 = arith.constant 0.0116099771 : f32
      %44 = vector.broadcast %cst_24 : f32 to vector<2x24xf32>
      %45 = arith.mulf %43, %44 : vector<2x24xf32>
      %46 = arith.mulf %45, %45 : vector<2x24xf32>
      %47 = vector.shape_cast %46 : vector<2x24xf32> to vector<1x2x24xf32>
      %cst_25 = arith.constant dense<0.000000e+00> : vector<1xf32>
      %48 = vector.multi_reduction <add>, %47, %cst_25 [1, 2] : vector<1x2x24xf32> to vector<1xf32>
      %49 = vector.shape_cast %48 : vector<1xf32> to vector<1x1x1xf32>
      %50 = vector.extract %49[0, 0, 0] : f32 from vector<1x1x1xf32>
      %cst_26 = arith.constant 0.0416666679 : f32
      %51 = arith.mulf %cst_26, %50 : f32
      %c2 = arith.constant 2 : index
      %52 = memref.load %arg7[%c2] : memref<3xf32, #tpu.memory_space<smem>>
      memref.store %51, %arg7[%c2] : memref<3xf32, #tpu.memory_space<smem>>
    } else {
    }
    return
  }
  func.func @transform_0(%arg0: i32, %arg1: i32) -> (i32, i32) {
    %c0_i32 = arith.constant 0 : i32
    return %arg0, %arg1 : i32, i32
  }
  func.func @transform_1(%arg0: i32, %arg1: i32) -> (i32, i32) {
    %c0_i32 = arith.constant 0 : i32
    return %arg0, %arg1 : i32, i32
  }
  func.func @transform_2(%arg0: i32, %arg1: i32) -> (i32, i32) {
    %c0_i32 = arith.constant 0 : i32
    return %arg0, %arg1 : i32, i32
  }
  func.func @transform_3(%arg0: i32, %arg1: i32) -> (i32, i32) {
    %c0_i32 = arith.constant 0 : i32
    %c0_i32_0 = arith.constant 0 : i32
    %c0_i32_1 = arith.constant 0 : i32
    return %c0_i32, %c0_i32_0 : i32, i32
  }
  func.func @transform_4(%arg0: i32, %arg1: i32) -> (i32, i32) {
    %c0_i32 = arith.constant 0 : i32
    %c0_i32_0 = arith.constant 0 : i32
    %c0_i32_1 = arith.constant 0 : i32
    return %c0_i32, %c0_i32_0 : i32, i32
  }
  func.func @transform_5(%arg0: i32, %arg1: i32) -> i32 {
    %c0_i32 = arith.constant 0 : i32
    %c0_i32_0 = arith.constant 0 : i32
    return %c0_i32 : i32
  }
}

</mosaic_0001>

<bundles_post_ra>
// kernel: tpu_custom_call.1
= control target key start
LH: loop header
LB: loop body
LE: loop exit
PB: predicated region body
PF: predicated region fallthrough
CT: control target
= control target key end

     0   :  { %10 = vsyncpa [#allocation4], 0  ;;  %s1824_s0 = inlined_call_operand.hbm [shape: f32[160,300], index: 0, kind: input, shape index: {}]   ;;  %s1825_s1 = inlined_call_operand.hbm [shape: f32[160,300], index: 1, kind: input, shape index: {}]   ;;  %s1826_s2 = inlined_call_operand.hbm [shape: f32[160,300], index: 2, kind: input, shape index: {}]   ;;  %s1827_s3 = inlined_call_operand.vmem [shape: f32[2,24], index: 3, kind: input, shape index: {}]   ;;  %s1828_s4 = inlined_call_operand.vmem [shape: f32[2,24], index: 4, kind: input, shape index: {}]   ;;  %s1829_s5 = inlined_call_operand.hbm [shape: f32[3], index: 5, kind: output, shape index: {}]  }
   0x1   :  { %11 = vsyncpa [#allocation7], 0 }
   0x2   :  { %12 = vsyncpa [#allocation5], 0  ;;  %s1063_s18 = smov [#allocation6]   ;;  %s1064_s20 = smov [#allocation3]  }
   0x3   :  { %s30_s19 = sshll.u32 %s1063_s18, 4  ;;  %s18_s21 = sshll.u32 %s1064_s20, 4  ;;  %s31_s19 = int_to_ptr.vmem [resolvable:$true] %s30_s19  ;;  %s1099_s21 = int_to_ptr.vmem [resolvable:$true] %s18_s21 }
   0x4   :  { %s981_s24 = scalar_lea.hbm %s1825_s1, 7680 }
   0x5   :  { %p982_p0 = scmp.ne.s32.totalorder %s1825_s1, %s981_s24  ;;  %p985_p1 = scmp.lt.u32.totalorder %s981_s24, %s1825_s1 }
   0x7   :  { %p987_p2 = pnand %p985_p1, %p982_p0 }
   0x9   :  { %990 = shalt.err (!%p987_p2)
}
   0xa   :  { %s991_s29 = scalar_lea.vmem %s31_s19, 7680  ;;  %p996_p4 = scmp.lt.s32.totalorder %s31_s19, %s31_s19 }
   0xb   :  { %p992_p3 = scmp.ne.s32.totalorder %s31_s19, %s991_s29  ;;  %p997_p5 = scmp.lt.s32.totalorder %s991_s29, %s991_s29 }
   0xd   :  { %p998_p6 = por %p997_p5, %p996_p4 }
   0xf   :  { %p999_p7 = pnand %p998_p6, %p992_p3 }
  0x11   :  { %1002 = shalt.err (!%p999_p7)
}
  0x12   :  { %s1065_s30 = smov 384   ;;  %s1066_s6 = smov 24  }
  0x13   :  { %36 = dma.hbm_to_vmem [thread:$0]  %s1825_s1, 7680, %s31_s19, [#allocation7], %s1065_s30, %s1065_s30, %s1066_s6  }
  0x14   :  { %s1003_s11 = scalar_lea.hbm %s1824_s0, 7680 }
  0x15   :  { %p1004_p8 = scmp.ne.s32.totalorder %s1824_s0, %s1003_s11  ;;  %p1007_p9 = scmp.lt.u32.totalorder %s1003_s11, %s1824_s0 }
  0x17   :  { %p1009_p10 = pnand %p1007_p9, %p1004_p8 }
  0x19   :  { %1012 = shalt.err (!%p1009_p10)
}
  0x1a   :  { %s1013_s16 = scalar_lea.vmem %s1099_s21, 7680  ;;  %p1018_p12 = scmp.lt.s32.totalorder %s1099_s21, %s1099_s21 }
  0x1b   :  { %p1014_p11 = scmp.ne.s32.totalorder %s1099_s21, %s1013_s16  ;;  %p1019_p13 = scmp.lt.s32.totalorder %s1013_s16, %s1013_s16 }
  0x1d   :  { %p1020_p0 = por %p1019_p13, %p1018_p12 }
  0x1f   :  { %p1021_p1 = pnand %p1020_p0, %p1014_p11 }
  0x21   :  { %1024 = shalt.err (!%p1021_p1)
}
  0x22   :  { %24 = dma.hbm_to_vmem [thread:$0]  %s1824_s0, 7680, %s1099_s21, [#allocation4], %s1065_s30, %s1065_s30, %s1066_s6  }
  0x23   :  { %s1067_s18 = smov [#allocation8]   ;;  %s1025_s23 = scalar_lea.hbm %s1826_s2, 7680 }
  0x24   :  { %s42_s19 = sshll.u32 %s1067_s18, 4  ;;  %p1026_p2 = scmp.ne.s32.totalorder %s1826_s2, %s1025_s23  ;;  %s43_s19 = int_to_ptr.vmem [resolvable:$true] %s42_s19 }
  0x25   :  { %p1029_p3 = scmp.lt.u32.totalorder %s1025_s23, %s1826_s2 }
  0x27   :  { %p1031_p4 = pnand %p1029_p3, %p1026_p2 }
  0x29   :  { %1034 = shalt.err (!%p1031_p4)
}
  0x2a   :  { %s1035_s28 = scalar_lea.vmem %s43_s19, 7680  ;;  %p1040_p6 = scmp.lt.s32.totalorder %s43_s19, %s43_s19 }
  0x2b   :  { %p1036_p5 = scmp.ne.s32.totalorder %s43_s19, %s1035_s28  ;;  %p1041_p7 = scmp.lt.s32.totalorder %s1035_s28, %s1035_s28 }
  0x2d   :  { %p1042_p8 = por %p1041_p7, %p1040_p6 }
  0x2f   :  { %p1043_p9 = pnand %p1042_p8, %p1036_p5 }
  0x31   :  { %1046 = shalt.err (!%p1043_p9)
}
  0x32   :  { %48 = dma.hbm_to_vmem [thread:$0]  %s1826_s2, 7680, %s43_s19, [#allocation7], %s1065_s30, %s1065_s30, %s1066_s6  }
  0x33   :  { %1057 = dma.done.wait [#allocation4], 7680  }
  0x34   :  { %1058 = vsyncadd [#allocation4], 4294959616 }
  0x35   :  { %1059 = dma.done.wait [#allocation7], 15360  }
  0x36   :  { %1060 = vsyncadd [#allocation7], 4294951936  ;;  %v927_v0 = vld [vmem:[%s1827_s3] sm:$0x3]  ;;  %vm932_vm0 = vcmask 189440   ;;  %v1159_v7 = vld [vmem:[#allocation8 + $0x8] sm:$0xff] }
  0x37   :  { %v928_v1 = vld [vmem:[%s1828_s4] sm:$0x3]  ;;  %1906 = vst [vmem:[#allocation14_spill] sm:$0xff] %v1159_v7  ;;  %v1161_v8 = vld [vmem:[#allocation8 + $0x10] sm:$0xff]  ;;  %v133_v10 = vld [vmem:[#allocation3 + $0x8] sm:$0xff]  ;;  %vm614_vm1 = vcmask 359424  }
  0x38   :  { %v929_v2 = vsub.f32 %v927_v0, %v928_v1  ;;  %v1157_v6 = vld [vmem:[#allocation8] sm:$0xff]  ;;  %1907 = vst [vmem:[#allocation15_spill] sm:$0xff] %v1161_v8  ;;  %v134_v11 = vld [vmem:[#allocation3 + $0x10] sm:$0xff]  ;;  %v193_v13 = vsub.f32 %v133_v10, %v1159_v7  ;;  %v1166_v15 = vld [vmem:[#allocation8 + $0x18] sm:$0xff]  ;;  %s1047_s13 = scalar_lea.hbm %s1829_s5, 16 }
  0x39   :  { %1905 = vst [vmem:[#allocation13_spill] sm:$0xff] %v1157_v6  ;;  %v132_v9 = vld [vmem:[#allocation3] sm:$0xff]  ;;  %v194_v14 = vsub.f32 %v134_v11, %v1161_v8  ;;  %1908 = vst [vmem:[#allocation16_spill] sm:$0xff] %v1166_v15  ;;  %v135_v16 = vld [vmem:[#allocation3 + $0x18] sm:$0xff]  ;;  %p1048_p10 = scmp.ne.s32.totalorder %s1829_s5, %s1047_s13  ;;  %p1051_p11 = scmp.lt.u32.totalorder %s1047_s13, %s1829_s5 }
  0x3a   :  { %v930_v3 = vmul.f32 0.011609977, %v929_v2  ;;  %v192_v12 = vsub.f32 %v132_v9, %v1157_v6  ;;  %v1168_v17 = vld [vmem:[#allocation8 + $0x28] sm:$0xff]  ;;  %v1170_v19 = vld [vmem:[#allocation8 + $0x20] sm:$0xff]  ;;  %v195_v21 = vsub.f32 %v135_v16, %v1166_v15  ;;  %v373_v23 = vand.u32 2147483647, %v193_v13 }
  0x3b   :  { %1909 = vst [vmem:[#allocation17_spill] sm:$0xff] %v1168_v17  ;;  %v137_v18 = vld [vmem:[#allocation3 + $0x28] sm:$0xff]  ;;  %1910 = vst [vmem:[#allocation18_spill] sm:$0xff] %v1170_v19  ;;  %v136_v20 = vld [vmem:[#allocation3 + $0x20] sm:$0xff]  ;;  %v374_v24 = vand.u32 2147483647, %v194_v14  ;;  %p1053_p12 = pnand %p1051_p11, %p1048_p10 }
  0x3c   :  { %v931_v4 = vmul.f32 %v930_v3, %v930_v3  ;;  %v372_v22 = vand.u32 2147483647, %v192_v12  ;;  %v197_v25 = vsub.f32 %v137_v18, %v1168_v17  ;;  %v196_v26 = vsub.f32 %v136_v20, %v1170_v19  ;;  %v1175_v27 = vld [vmem:[#allocation8 + $0x30] sm:$0xff]  ;;  %v1177_v28 = vld [vmem:[#allocation8 + $0x38] sm:$0xff]  ;;  %v1179_v30 = vld [vmem:[#allocation8 + $0x40] sm:$0xff] }
  0x3d   :  { %1911 = vst [vmem:[#allocation19_spill] sm:$0xff] %v1175_v27  ;;  %1912 = vst [vmem:[#allocation20_spill] sm:$0xff] %v1177_v28  ;;  %v138_v29 = vld [vmem:[#allocation3 + $0x30] sm:$0xff]  ;;  %v139_v31 = vld [vmem:[#allocation3 + $0x38] sm:$0xff]  ;;  %v375_v33 = vand.u32 2147483647, %v195_v21  ;;  %v494_v35 = vmul.f32 %v373_v23, %v373_v23  ;;  %v495_v36 = vmul.f32 %v374_v24, %v374_v24 }
  0x3e   :  { %v933_v5 = vsel %vm932_vm0, %v931_v4, 0.0  ;;  %1913 = vst [vmem:[#allocation21_spill] sm:$0xff] %v1179_v30  ;;  %v140_v32 = vld [vmem:[#allocation3 + $0x40] sm:$0xff]  ;;  %v493_v34 = vmul.f32 %v372_v22, %v372_v22  ;;  %v377_v37 = vand.u32 2147483647, %v197_v25  ;;  %v198_v38 = vsub.f32 %v138_v29, %v1175_v27  ;;  %v1184_v42 = vld [vmem:[#allocation8 + $0x48] sm:$0xff] }
  0x3f   :  { %934 = vadd.xlane.f32.xlu1 %v933_v5  ;;  %v376_v39 = vand.u32 2147483647, %v196_v26  ;;  %v199_v40 = vsub.f32 %v139_v31, %v1177_v28  ;;  %v200_v41 = vsub.f32 %v140_v32, %v1179_v30  ;;  %1914 = vst [vmem:[#allocation22_spill] sm:$0xff] %v1184_v42  ;;  %v141_v43 = vld [vmem:[#allocation3 + $0x48] sm:$0xff]  ;;  %v496_v44 = vmul.f32 %v375_v33, %v375_v33  ;;  %v1186_v49 = vld [vmem:[#allocation8 + $0x58] sm:$0xff]  ;;  %v1188_v53 = vld [vmem:[#allocation8 + $0x50] sm:$0xff] }
  0x40   :  { %v553_v45 = vadd.f32 %v493_v34, %v372_v22  ;;  %v554_v46 = vadd.f32 %v494_v35, %v373_v23  ;;  %v555_v47 = vadd.f32 %v495_v36, %v374_v24  ;;  %v498_v48 = vmul.f32 %v377_v37, %v377_v37  ;;  %1915 = vst [vmem:[#allocation23_spill] sm:$0xff] %v1186_v49  ;;  %v143_v50 = vld [vmem:[#allocation3 + $0x58] sm:$0xff]  ;;  %v142_v54 = vld [vmem:[#allocation3 + $0x50] sm:$0xff]  ;;  %v1194_v3 = vld [vmem:[#allocation8 + $0x60] sm:$0xff] }
  0x41   :  { %v378_v51 = vand.u32 2147483647, %v198_v38  ;;  %v497_v52 = vmul.f32 %v376_v39, %v376_v39  ;;  %1916 = vst [vmem:[#allocation24_spill] sm:$0xff] %v1188_v53  ;;  %v201_v55 = vsub.f32 %v141_v43, %v1184_v42  ;;  %v380_v56 = vand.u32 2147483647, %v200_v41  ;;  %1917 = vst [vmem:[#allocation25_spill] sm:$0xff] %v1194_v3 }
  0x42   :  { %v379_v57 = vand.u32 2147483647, %v199_v40  ;;  %v556_v58 = vadd.f32 %v496_v44, %v375_v33  ;;  %v613_v59 = vadd.f32 %v554_v46, %v553_v45  ;;  %v615_v60 = vsel %vm614_vm1, %v555_v47, 0.0  ;;  %v144_v4 = vld [vmem:[#allocation3 + $0x60] sm:$0xff]  ;;  %v1196_v9 = vld [vmem:[#allocation8 + $0x70] sm:$0xff]  ;;  %v1198_v14 = vld [vmem:[#allocation8 + $0x68] sm:$0xff] }
  0x43   :  { %v203_v61 = vsub.f32 %v143_v50, %v1186_v49  ;;  %v558_v62 = vadd.f32 %v498_v48, %v377_v37  ;;  %v202_v63 = vsub.f32 %v142_v54, %v1188_v53  ;;  %v499_v0 = vmul.f32 %v378_v51, %v378_v51  ;;  %1918 = vst [vmem:[#allocation26_spill] sm:$0xff] %v1196_v9  ;;  %v146_v10 = vld [vmem:[#allocation3 + $0x70] sm:$0xff]  ;;  %v145_v16 = vld [vmem:[#allocation3 + $0x68] sm:$0xff]  ;;  %v1204_v34 = vld [vmem:[#allocation8 + $0x78] sm:$0xff] }
  0x44   :  { %v557_v1 = vadd.f32 %v497_v52, %v376_v39  ;;  %v616_v2 = vadd.f32 %v615_v60, %v613_v59  ;;  %v501_v5 = vmul.f32 %v380_v56, %v380_v56  ;;  %v381_v11 = vand.u32 2147483647, %v201_v55  ;;  %1919 = vst [vmem:[#allocation27_spill] sm:$0xff] %v1198_v14  ;;  %1920 = vst [vmem:[#allocation28_spill] sm:$0xff] %v1204_v34  ;;  %v147_v35 = vld [vmem:[#allocation3 + $0x78] sm:$0xff]  ;;  %v1206_v37 = vld [vmem:[#allocation8 + $0x88] sm:$0xff] }
  0x45   :  { %v500_v12 = vmul.f32 %v379_v57, %v379_v57  ;;  %v383_v18 = vand.u32 2147483647, %v203_v61  ;;  %v619_v20 = vsel %vm614_vm1, %v558_v62, 0.0  ;;  %v204_v21 = vsub.f32 %v144_v4, %v1194_v3  ;;  %1921 = vst [vmem:[#allocation29_spill] sm:$0xff] %v1206_v37  ;;  %v149_v38 = vld [vmem:[#allocation3 + $0x88] sm:$0xff]  ;;  %v1208_v43 = vld [vmem:[#allocation8 + $0x80] sm:$0xff] }
  0x46   :  { %v617_v13 = vadd.f32 %v616_v2, %v556_v58  ;;  %v382_v22 = vand.u32 2147483647, %v202_v63  ;;  %v559_v23 = vadd.f32 %v499_v0, %v378_v51  ;;  %v206_v25 = vsub.f32 %v146_v10, %v1196_v9  ;;  %1922 = vst [vmem:[#allocation30_spill] sm:$0xff] %v1208_v43  ;;  %v148_v44 = vld [vmem:[#allocation3 + $0x80] sm:$0xff]  ;;  %v1214_v59 = vld [vmem:[#allocation8 + $0x90] sm:$0xff]  ;;  %v1218_v4 = vld [vmem:[#allocation8 + $0x98] sm:$0xff] }
  0x47   :  { %v561_v26 = vadd.f32 %v501_v5, %v380_v56  ;;  %v205_v29 = vsub.f32 %v145_v16, %v1198_v14  ;;  %v502_v31 = vmul.f32 %v381_v11, %v381_v11  ;;  %v560_v32 = vadd.f32 %v500_v12, %v379_v57  ;;  %1923 = vst [vmem:[#allocation31_spill] sm:$0xff] %v1214_v59  ;;  %v150_v60 = vld [vmem:[#allocation3 + $0x90] sm:$0xff]  ;;  %v1216_v62 = vld [vmem:[#allocation8 + $0xa0] sm:$0xff]  ;;  %v1220_v5 = vld [vmem:[#allocation8 + $0xa8] sm:$0xff] }
  0x48   :  { %v618_v24 = vadd.f32 %v617_v13, %v557_v1  ;;  %v504_v36 = vmul.f32 %v383_v18, %v383_v18  ;;  %v384_v39 = vand.u32 2147483647, %v204_v21  ;;  %v503_v40 = vmul.f32 %v382_v22, %v382_v22  ;;  %1924 = vst [vmem:[#allocation32_spill] sm:$0xff] %v1216_v62  ;;  %v152_v63 = vld [vmem:[#allocation3 + $0xa0] sm:$0xff]  ;;  %1925 = vst [vmem:[#allocation33_spill] sm:$0xff] %v1218_v4  ;;  %v151_v10 = vld [vmem:[#allocation3 + $0x98] sm:$0xff] }
  0x49   :  { %v386_v45 = vand.u32 2147483647, %v206_v25  ;;  %v623_v46 = vsel %vm614_vm1, %v561_v26, 0.0  ;;  %v207_v47 = vsub.f32 %v147_v35, %v1204_v34  ;;  %v385_v48 = vand.u32 2147483647, %v205_v29  ;;  %1926 = vst [vmem:[#allocation34_spill] sm:$0xff] %v1220_v5 }
  0x4a   :  { %v620_v33 = vadd.f32 %v619_v20, %v618_v24  ;;  %v562_v50 = vadd.f32 %v502_v31, %v381_v11  ;;  %v209_v52 = vsub.f32 %v149_v38, %v1206_v37  ;;  %v564_v54 = vadd.f32 %v504_v36, %v383_v18  ;;  %v1223_v13 = vld [vmem:[#allocation8 + $0xb0] sm:$0xff]  ;;  %v1225_v16 = vld [vmem:[#allocation8 + $0xb8] sm:$0xff]  ;;  %v1227_v18 = vld [vmem:[#allocation3 + $0xa8] sm:$0xff] }
  0x4b   :  { %v208_v55 = vsub.f32 %v148_v44, %v1208_v43  ;;  %v505_v56 = vmul.f32 %v384_v39, %v384_v39  ;;  %v563_v57 = vadd.f32 %v503_v40, %v382_v22  ;;  %v507_v61 = vmul.f32 %v386_v45, %v386_v45  ;;  %1927 = vst [vmem:[#allocation35_spill] sm:$0xff] %v1223_v13  ;;  %v1230_v24 = vld [vmem:[#allocation8 + $0xc0] sm:$0xff]  ;;  %v1232_v25 = vld [vmem:[#allocation8 + $0xc8] sm:$0xff]  ;;  %v1234_v26 = vld [vmem:[#allocation3 + $0xb0] sm:$0xff] }
  0x4c   :  { %v621_v41 = vadd.f32 %v620_v33, %v559_v23  ;;  %v387_v0 = vand.u32 2147483647, %v207_v47  ;;  %v506_v1 = vmul.f32 %v385_v48, %v385_v48  ;;  %v389_v11 = vand.u32 2147483647, %v209_v52  ;;  %1928 = vst [vmem:[#allocation36_spill] sm:$0xff] %v1225_v16  ;;  %1929 = vst [vmem:[#allocation37_spill] sm:$0xff] %v1230_v24 }
  0x4d   :  { %v627_v12 = vsel %vm614_vm1, %v564_v54, 0.0  ;;  %v210_v20 = vsub.f32 %v150_v60, %v1214_v59  ;;  %v388_v21 = vand.u32 2147483647, %v208_v55  ;;  %v565_v22 = vadd.f32 %v505_v56, %v384_v39  ;;  %1930 = vst [vmem:[#allocation38_spill] sm:$0xff] %v1232_v25  ;;  %v1239_v33 = vld [vmem:[#allocation8 + $0xd8] sm:$0xff]  ;;  %v1243_v36 = vld [vmem:[#allocation3 + $0xc0] sm:$0xff] }
  0x4e   :  { %v622_v51 = vadd.f32 %v621_v41, %v560_v32  ;;  %v212_v29 = vsub.f32 %v152_v63, %v1216_v62  ;;  %v567_v31 = vadd.f32 %v507_v61, %v386_v45  ;;  %v1237_v32 = vld [vmem:[#allocation8 + $0xd0] sm:$0xff]  ;;  %1932 = vst [vmem:[#allocation40_spill] sm:$0xff] %v1239_v33  ;;  %v1241_v35 = vld [vmem:[#allocation3 + $0xb8] sm:$0xff]  ;;  %v211_v38 = vsub.f32 %v151_v10, %v1218_v4  ;;  %v1246_v44 = vld [vmem:[#allocation8 + $0xe0] sm:$0xff] }
  0x4f   :  { %1931 = vst [vmem:[#allocation39_spill] sm:$0xff] %v1237_v32  ;;  %v508_v39 = vmul.f32 %v387_v0, %v387_v0  ;;  %v566_v40 = vadd.f32 %v506_v1, %v385_v48  ;;  %1933 = vst [vmem:[#allocation41_spill] sm:$0xff] %v1246_v44  ;;  %v1250_v47 = vld [vmem:[#allocation3 + $0xc8] sm:$0xff]  ;;  %v213_v45 = vsub.f32 %v1227_v18, %v1220_v5  ;;  %v1256_v52 = vld [vmem:[#allocation8 + $0xf8] sm:$0xff] }
  0x50   :  { %v624_v58 = vadd.f32 %v623_v46, %v622_v51  ;;  %v1248_v46 = vld [vmem:[#allocation8 + $0xe8] sm:$0xff]  ;;  %v1254_v51 = vld [vmem:[#allocation8 + $0xf0] sm:$0xff]  ;;  %1936 = vst [vmem:[#allocation44_spill] sm:$0xff] %v1256_v52  ;;  %v1260_v55 = vld [vmem:[#allocation3 + $0xd8] sm:$0xff]  ;;  %v214_v56 = vsub.f32 %v1234_v26, %v1223_v13  ;;  %v631_v18 = vsel %vm614_vm1, %v567_v31, 0.0 }
  0x51   :  { %1934 = vst [vmem:[#allocation42_spill] sm:$0xff] %v1248_v46  ;;  %1935 = vst [vmem:[#allocation43_spill] sm:$0xff] %v1254_v51  ;;  %v1258_v54 = vld [vmem:[#allocation3 + $0xd0] sm:$0xff]  ;;  %v1262_v48 = vld [vmem:[#allocation3 + $0xe0] sm:$0xff]  ;;  %v391_v13 = vand.u32 2147483647, %v211_v38  ;;  %v568_v5 = vadd.f32 %v508_v39, %v387_v0 }
  0x52   :  { %v625_v2 = vadd.f32 %v624_v58, %v562_v50  ;;  %v510_v50 = vmul.f32 %v389_v11, %v389_v11  ;;  %v509_v58 = vmul.f32 %v388_v21, %v388_v21  ;;  %v1266_v61 = vld [vmem:[#allocation8 + $0x100] sm:$0xff]  ;;  %v1268_v63 = vld [vmem:[#allocation8 + $0x108] sm:$0xff]  ;;  %v1301_v0 = vld [vmem:[#allocation8 + $0x130] sm:$0xff]  ;;  %v393_v14 = vand.u32 2147483647, %v213_v45 }
  0x53   :  { %1937 = vst [vmem:[#allocation45_spill] sm:$0xff] %v1266_v61  ;;  %1938 = vst [vmem:[#allocation46_spill] sm:$0xff] %v1268_v63  ;;  %v1270_v1 = vld [vmem:[#allocation3 + $0xe8] sm:$0xff]  ;;  %v1283_v26 = vld [vmem:[#allocation3 + $0x100] sm:$0xff]  ;;  %v512_v3 = vmul.f32 %v391_v13, %v391_v13  ;;  %v394_v17 = vand.u32 2147483647, %v214_v56 }
  0x54   :  { %v626_v23 = vadd.f32 %v625_v2, %v563_v57  ;;  %v390_v57 = vand.u32 2147483647, %v210_v20  ;;  %v215_v2 = vsub.f32 %v1241_v35, %v1225_v16  ;;  %v1279_v20 = vld [vmem:[#allocation3 + $0xf0] sm:$0xff]  ;;  %v1287_v16 = vld [vmem:[#allocation8 + $0x118] sm:$0xff]  ;;  %v1289_v10 = vld [vmem:[#allocation8 + $0x120] sm:$0xff]  ;;  %v570_v59 = vadd.f32 %v510_v50, %v389_v11  ;;  %1943 = vst [vmem:[#allocation51_spill] sm:$0xff] %v1301_v0 }
  0x55   :  { %1940 = vst [vmem:[#allocation48_spill] sm:$0xff] %v1287_v16  ;;  %1941 = vst [vmem:[#allocation49_spill] sm:$0xff] %v1289_v10  ;;  %v1303_v38 = vld [vmem:[#allocation3 + $0x110] sm:$0xff]  ;;  %v1305_v39 = vld [vmem:[#allocation3 + $0x118] sm:$0xff]  ;;  %v569_v31 = vadd.f32 %v509_v58, %v388_v21 }
  0x56   :  { %v628_v41 = vadd.f32 %v627_v12, %v626_v23  ;;  %v392_v12 = vand.u32 2147483647, %v212_v29  ;;  %v1277_v23 = vld [vmem:[#allocation8 + $0x110] sm:$0xff]  ;;  %v1291_v29 = vld [vmem:[#allocation3 + $0x108] sm:$0xff]  ;;  %v1309_v43 = vld [vmem:[#allocation8 + $0x138] sm:$0xff]  ;;  %v635_v27 = vsel %vm614_vm1, %v570_v59, 0.0  ;;  %v572_v59 = vadd.f32 %v512_v3, %v391_v13 }
  0x57   :  { %1939 = vst [vmem:[#allocation47_spill] sm:$0xff] %v1277_v23  ;;  %1944 = vst [vmem:[#allocation52_spill] sm:$0xff] %v1309_v43  ;;  %v1311_v62 = vld [vmem:[#allocation8 + $0x140] sm:$0xff]  ;;  %v1323_v21 = vld [vmem:[#allocation8 + $0x150] sm:$0xff]  ;;  %v395_v28 = vand.u32 2147483647, %v215_v2  ;;  %v1964_v13 = vsub.f32 %v1258_v54, %v1237_v32 }
  0x58   :  { %v629_v60 = vadd.f32 %v628_v41, %v565_v22  ;;  %v1281_v22 = vld [vmem:[#allocation3 + $0xf8] sm:$0xff]  ;;  %v1299_v41 = vld [vmem:[#allocation8 + $0x128] sm:$0xff]  ;;  %1945 = vst [vmem:[#allocation53_spill] sm:$0xff] %v1311_v62  ;;  %v1313_v4 = vld [vmem:[#allocation3 + $0x120] sm:$0xff]  ;;  %v513_v9 = vmul.f32 %v392_v12, %v392_v12 }
  0x59   :  { %1942 = vst [vmem:[#allocation50_spill] sm:$0xff] %v1299_v41  ;;  %1947 = vst [vmem:[#allocation55_spill] sm:$0xff] %v1323_v21  ;;  %v1325_v58 = vld [vmem:[#allocation3 + $0x128] sm:$0xff]  ;;  %v1333_v49 = vld [vmem:[#allocation8 + $0x158] sm:$0xff] }
  0x5a   :  { %v630_v35 = vadd.f32 %v629_v60, %v566_v40  ;;  %v511_v60 = vmul.f32 %v390_v57, %v390_v57  ;;  %v1321_v40 = vld [vmem:[#allocation8 + $0x148] sm:$0xff]  ;;  %1948 = vst [vmem:[#allocation56_spill] sm:$0xff] %v1325_v58  ;;  %1950 = vst [vmem:[#allocation58_spill] sm:$0xff] %v1333_v49  ;;  %v1335_v34 = vld [vmem:[#allocation8 + $0x160] sm:$0xff]  ;;  %v573_v16 = vadd.f32 %v513_v9, %v392_v12 }
  0x5b   :  { %1946 = vst [vmem:[#allocation54_spill] sm:$0xff] %v1321_v40  ;;  %1951 = vst [vmem:[#allocation59_spill] sm:$0xff] %v1335_v34  ;;  %v1337_v53 = vld [vmem:[#allocation3 + $0x140] sm:$0xff]  ;;  %v1344_v19 = vld [vmem:[#allocation8 + $0x168] sm:$0xff]  ;;  %v1962_v9 = vsub.f32 %v1243_v36, %v1230_v24  ;;  %v515_v12 = vmul.f32 %v394_v17, %v394_v17  ;;  %v398_v34 = vand.u32 2147483647, %v1964_v13 }
  0x5c   :  { %v632_v37 = vadd.f32 %v631_v18, %v630_v35  ;;  %v1327_v18 = vld [vmem:[#allocation3 + $0x130] sm:$0xff]  ;;  %v1329_v35 = vld [vmem:[#allocation3 + $0x138] sm:$0xff]  ;;  %1952 = vst [vmem:[#allocation60_spill] sm:$0xff] %v1344_v19  ;;  %v1346_v45 = vld [vmem:[#allocation3 + $0x148] sm:$0xff]  ;;  %v571_v15 = vadd.f32 %v511_v60, %v390_v57  ;;  %v639_v36 = vsel %vm614_vm1, %v573_v16, 0.0 }
  0x5d   :  { %1949 = vst [vmem:[#allocation57_spill] sm:$0xff] %v1329_v35  ;;  %1953 = vst [vmem:[#allocation61_spill] sm:$0xff] %v1346_v45  ;;  %v1354_v8 = vld [vmem:[#allocation8 + $0x170] sm:$0xff]  ;;  %v1356_v30 = vld [vmem:[#allocation8 + $0x178] sm:$0xff]  ;;  %v516_v35 = vmul.f32 %v395_v28, %v395_v28  ;;  %v396_v40 = vand.u32 2147483647, %v1962_v9  ;;  %v519_v32 = vmul.f32 %v398_v34, %v398_v34 }
  0x5e   :  { %v633_v50 = vadd.f32 %v632_v37, %v568_v5  ;;  %v1348_v37 = vld [vmem:[#allocation3 + $0x150] sm:$0xff]  ;;  %v1350_v5 = vld [vmem:[#allocation3 + $0x158] sm:$0xff]  ;;  %1956 = vst [vmem:[#allocation64_spill] sm:$0xff] %v1354_v8  ;;  %1957 = vst [vmem:[#allocation65_spill] sm:$0xff] %v1356_v30 }
  0x5f   :  { %1954 = vst [vmem:[#allocation62_spill] sm:$0xff] %v1348_v37  ;;  %1955 = vst [vmem:[#allocation63_spill] sm:$0xff] %v1350_v5  ;;  %v1358_v2 = vld [vmem:[#allocation3 + $0x160] sm:$0xff]  ;;  %v1368_v56 = vld [vmem:[#allocation8 + $0x188] sm:$0xff]  ;;  %v1965_v5 = vsub.f32 %v1250_v47, %v1232_v25  ;;  %v576_v30 = vadd.f32 %v516_v35, %v395_v28 }
  0x60   :  { %v634_v42 = vadd.f32 %v633_v50, %v569_v31  ;;  %v1366_v11 = vld [vmem:[#allocation8 + $0x180] sm:$0xff]  ;;  %1959 = vst [vmem:[#allocation67_spill] sm:$0xff] %v1368_v56  ;;  %v1370_v57 = vld [vmem:[#allocation3 + $0x168] sm:$0xff]  ;;  %v1372_v31 = vld [vmem:[#allocation3 + $0x170] sm:$0xff]  ;;  %v514_v50 = vmul.f32 %v393_v14, %v393_v14 }
  0x61   :  { %1958 = vst [vmem:[#allocation66_spill] sm:$0xff] %v1366_v11  ;;  %1960 = vst [vmem:[#allocation68_spill] sm:$0xff] %v1372_v31  ;;  %v1376_v58 = vld [vmem:[#allocation8 + $0x190] sm:$0xff]  ;;  %v1378_v7 = vld [vmem:[#allocation8 + $0x198] sm:$0xff]  ;;  %v397_v19 = vand.u32 2147483647, %v1965_v5 }
  0x62   :  { %v636_v41 = vadd.f32 %v635_v27, %v634_v42  ;;  %1961 = vst [vmem:[#allocation69_spill] sm:$0xff] %v1376_v58  ;;  %v1380_v6 = vld [vmem:[#allocation3 + $0x178] sm:$0xff]  ;;  %v1388_v60 = vld [vmem:[#allocation8 + $0x1a0] sm:$0xff]  ;;  %v1392_v27 = vld [vmem:[#allocation3 + $0x188] sm:$0xff]  ;;  %v574_v45 = vadd.f32 %v514_v50, %v393_v14  ;;  %v575_v50 = vadd.f32 %v515_v12, %v394_v17 }
  0x63   :  { %v1390_v3 = vld [vmem:[#allocation3 + $0x180] sm:$0xff]  ;;  %v1394_v42 = vld [vmem:[#allocation3 + $0x190] sm:$0xff]  ;;  %v1401_v37 = vld [vmem:[#allocation8 + $0x1a8] sm:$0xff] }
  0x64   :  { %v637_v21 = vadd.f32 %v636_v41, %v571_v15  ;;  %1963 = vst [vmem:[#allocation70_spill] sm:$0xff] %v1401_v37  ;;  %v1403_v43 = vld [vmem:[#allocation8 + $0x1b0] sm:$0xff]  ;;  %v1405_v49 = vld [vmem:[#allocation3 + $0x198] sm:$0xff]  ;;  %v1415_v9 = vld [vmem:[#allocation3 + $0x1a0] sm:$0xff] }
  0x65   :  { %v1417_v15 = vld [vmem:[#allocation3 + $0x1a8] sm:$0xff]  ;;  %v1419_v41 = vld [vmem:[#allocation3 + $0x1b0] sm:$0xff]  ;;  %v1426_v31 = vld [vmem:[#allocation8 + $0x1b8] sm:$0xff]  ;;  %v243_v5 = vsub.f32 %v1405_v49, %v1378_v7  ;;  %v244_v24 = vsub.f32 %v1415_v9, %v1388_v60  ;;  %v518_v49 = vmul.f32 %v397_v19, %v397_v19  ;;  %v1968_v9 = vsub.f32 %v1270_v1, %v1248_v46 }
  0x66   :  { %v638_v8 = vadd.f32 %v637_v21, %v572_v59  ;;  %v1428_v54 = vld [vmem:[#allocation8 + $0x1c0] sm:$0xff]  ;;  %v1430_v16 = vld [vmem:[#allocation3 + $0x1b8] sm:$0xff]  ;;  %v1438_v47 = vld [vmem:[#allocation8 + $0x1c8] sm:$0xff]  ;;  %v517_v59 = vmul.f32 %v396_v40, %v396_v40  ;;  %v245_v28 = vsub.f32 %v1417_v15, %v1401_v37  ;;  %v246_v35 = vsub.f32 %v1419_v41, %v1403_v43 }
  0x67   :  { %1966 = vst [vmem:[#allocation71_spill] sm:$0xff] %v1428_v54  ;;  %v1440_v14 = vld [vmem:[#allocation3 + $0x1c0] sm:$0xff]  ;;  %v1442_v21 = vld [vmem:[#allocation3 + $0x1c8] sm:$0xff]  ;;  %v1446_v13 = vld [vmem:[#allocation8 + $0x1d0] sm:$0xff]  ;;  %v247_v7 = vsub.f32 %v1430_v16, %v1426_v31  ;;  %v401_v43 = vand.u32 2147483647, %v1968_v9  ;;  %v1970_v16 = vsub.f32 %v1279_v20, %v1254_v51  ;;  %v578_v20 = vadd.f32 %v518_v49, %v397_v19 }
  0x68   :  { %v640_v25 = vadd.f32 %v639_v36, %v638_v8  ;;  %v1448_v11 = vld [vmem:[#allocation3 + $0x1d0] sm:$0xff]  ;;  %v1967_v8 = vsub.f32 %v1260_v55, %v1239_v33  ;;  %v248_v36 = vsub.f32 %v1440_v14, %v1428_v54  ;;  %v249_v60 = vsub.f32 %v1442_v21, %v1438_v47  ;;  %v1987_v54 = vld [vmem:[#allocation61_spill] sm:$0xff] }
  0x69   :  { %v643_v15 = vsel %vm614_vm1, %v576_v30, 0.0  ;;  %v250_v31 = vsub.f32 %v1448_v11, %v1446_v13  ;;  %v1969_v55 = vsub.f32 %v1262_v48, %v1246_v44  ;;  %v402_v14 = vand.u32 2147483647, %v1970_v16  ;;  %v1483_v11 = vld [vmem:[#allocation8 + $0x1d8] sm:$0xff] }
  0x6a   :  { %v399_v17 = vand.u32 2147483647, %v1967_v8  ;;  %v641_v12 = vadd.f32 %v640_v25, %v574_v45  ;;  %v577_v25 = vadd.f32 %v517_v59, %v396_v40  ;;  %v1971_v47 = vsub.f32 %v1281_v22, %v1256_v52  ;;  %1973 = vst [vmem:[#allocation72_spill] sm:$0xff] %v1483_v11  ;;  %v191_v13 = vld [vmem:[#allocation3 + $0x1d8] sm:$0xff] }
  0x6b   :  { %v400_v41 = vand.u32 2147483647, %v1969_v55  ;;  %v1972_v30 = vsub.f32 %v1283_v26, %v1266_v61  ;;  %v579_v8 = vadd.f32 %v519_v32, %v398_v34  ;;  %v1974_v48 = vsub.f32 %v1291_v29, %v1268_v63  ;;  %v1976_v26 = vld [vmem:[#allocation48_spill] sm:$0xff] }
  0x6c   :  { %v642_v45 = vadd.f32 %v641_v12, %v575_v50  ;;  %v403_v1 = vand.u32 2147483647, %v1971_v47  ;;  %v520_v59 = vmul.f32 %v399_v17, %v399_v17  ;;  %v1975_v22 = vsub.f32 %v1303_v38, %v1277_v23  ;;  %v1979_v16 = vld [vmem:[#allocation56_spill] sm:$0xff]  ;;  %v1980_v47 = vld [vmem:[#allocation50_spill] sm:$0xff] }
  0x6d   :  { %v404_v21 = vand.u32 2147483647, %v1972_v30  ;;  %v1488_v40 = vand.u32 2147483647, %v1974_v48  ;;  %v1977_v9 = vsub.f32 %v1305_v39, %v1976_v26  ;;  %v1978_v32 = vsub.f32 %v1313_v4, %v1289_v10  ;;  %v1983_v48 = vld [vmem:[#allocation57_spill] sm:$0xff] }
  0x6e   :  { %v644_v50 = vadd.f32 %v643_v15, %v642_v45  ;;  %v1493_v12 = vand.u32 2147483647, %v1975_v22  ;;  %v522_v29 = vmul.f32 %v401_v43, %v401_v43  ;;  %v1981_v19 = vsub.f32 %v1979_v16, %v1980_v47  ;;  %v1984_v22 = vld [vmem:[#allocation52_spill] sm:$0xff]  ;;  %v1994_v47 = vld [vmem:[#allocation58_spill] sm:$0xff] }
  0x6f   :  { %v1498_v34 = vand.u32 2147483647, %v1977_v9  ;;  %v1503_v55 = vand.u32 2147483647, %v1978_v32  ;;  %v1982_v38 = vsub.f32 %v1327_v18, %v1301_v0  ;;  %v521_v45 = vmul.f32 %v400_v41, %v400_v41  ;;  %v1988_v18 = vld [vmem:[#allocation54_spill] sm:$0xff] }
  0x70   :  { %v1508_v49 = vand.u32 2147483647, %v1981_v19  ;;  %v645_v39 = vadd.f32 %v644_v50, %v577_v25  ;;  %v251_v30 = vsub.f32 %v191_v13, %v1483_v11  ;;  %v1985_v4 = vsub.f32 %v1983_v48, %v1984_v22  ;;  %v1990_v25 = vld [vmem:[#allocation62_spill] sm:$0xff]  ;;  %v1991_v50 = vld [vmem:[#allocation55_spill] sm:$0xff] }
  0x71   :  { %v1513_v15 = vand.u32 2147483647, %v1982_v38  ;;  %v1986_v32 = vsub.f32 %v1337_v53, %v1311_v62  ;;  %v647_v19 = vsel %vm614_vm1, %v579_v8, 0.0  ;;  %v1989_v38 = vsub.f32 %v1987_v54, %v1988_v18  ;;  %v1993_v22 = vld [vmem:[#allocation63_spill] sm:$0xff]  ;;  %v1998_v54 = vld [vmem:[#allocation60_spill] sm:$0xff] }
  0x72   :  { %v1519_v9 = vand.u32 2147483647, %v1985_v4  ;;  %v1992_v13 = vsub.f32 %v1990_v25, %v1991_v50  ;;  %v580_v48 = vadd.f32 %v520_v59, %v399_v17  ;;  %v646_v4 = vadd.f32 %v645_v39, %v578_v20  ;;  %v2001_v50 = vld [vmem:[#allocation64_spill] sm:$0xff] }
  0x73   :  { %v1524_v16 = vand.u32 2147483647, %v1986_v32  ;;  %v1530_v37 = vand.u32 2147483647, %v1989_v38  ;;  %v1995_v0 = vsub.f32 %v1993_v22, %v1994_v47  ;;  %v1996_v32 = vld [vmem:[#allocation59_spill] sm:$0xff]  ;;  %v1999_v38 = vsub.f32 %v1370_v57, %v1998_v54  ;;  %v2003_v22 = vld [vmem:[#allocation65_spill] sm:$0xff] }
  0x74   :  { %v1535_v11 = vand.u32 2147483647, %v1992_v13  ;;  %v1997_v8 = vsub.f32 %v1358_v2, %v1996_v32  ;;  %v582_v25 = vadd.f32 %v522_v29, %v401_v43  ;;  %v2000_v13 = vld [vmem:[#allocation68_spill] sm:$0xff]  ;;  %v523_v20 = vmul.f32 %v402_v14, %v402_v14 }
  0x75   :  { %v1540_v53 = vand.u32 2147483647, %v1995_v0  ;;  %v1550_v18 = vand.u32 2147483647, %v1999_v38  ;;  %v2002_v17 = vsub.f32 %v2000_v13, %v2001_v50  ;;  %v581_v39 = vadd.f32 %v521_v45, %v400_v41  ;;  %v2016_v54 = vld [vmem:[#allocation16_spill] sm:$0xff] }
  0x76   :  { %v1545_v62 = vand.u32 2147483647, %v1997_v8  ;;  %v648_v0 = vadd.f32 %v647_v19, %v646_v4  ;;  %v2004_v47 = vsub.f32 %v1380_v6, %v2003_v22  ;;  %v2005_v8 = vld [vmem:[#allocation66_spill] sm:$0xff]  ;;  %v2007_v43 = vsub.f32 %v1392_v27, %v1368_v56  ;;  %v252_v56 = vld [vmem:[#allocation6] sm:$0xff] }
  0x77   :  { %v1555_v59 = vand.u32 2147483647, %v2002_v17  ;;  %v2006_v32 = vsub.f32 %v1390_v3, %v2005_v8  ;;  %v525_v38 = vmul.f32 %v404_v21, %v404_v21  ;;  %v2008_v41 = vsub.f32 %v1394_v42, %v1376_v58  ;;  %v253_v42 = vld [vmem:[#allocation6 + $0x8] sm:$0xff] }
  0x78   :  { %v1560_v2 = vand.u32 2147483647, %v2004_v47  ;;  %v1570_v29 = vand.u32 2147483647, %v2007_v43  ;;  %v1577_v19 = vand.u32 2147483647, %v243_v5  ;;  %v524_v6 = vmul.f32 %v403_v1, %v403_v1 }
  0x79   :  { %v1565_v57 = vand.u32 2147483647, %v2006_v32  ;;  %v1575_v45 = vand.u32 2147483647, %v2008_v41  ;;  %v649_v47 = vadd.f32 %v648_v0, %v580_v48  ;;  %v1579_v4 = vand.u32 2147483647, %v244_v24 }
  0x7a   :  { %v1581_v3 = vand.u32 2147483647, %v245_v28  ;;  %v651_v32 = vsel %vm614_vm1, %v582_v25, 0.0  ;;  %v1584_v13 = vand.u32 2147483647, %v246_v35  ;;  %v583_v17 = vadd.f32 %v523_v20, %v402_v14  ;;  %v2013_v20 = vld [vmem:[#allocation13_spill] sm:$0xff] }
  0x7b   :  { %v1586_v27 = vand.u32 2147483647, %v247_v7  ;;  %v650_v43 = vadd.f32 %v649_v47, %v581_v39  ;;  %v1588_v41 = vand.u32 2147483647, %v248_v36  ;;  %v1590_v5 = vand.u32 2147483647, %v249_v60 }
  0x7c   :  { %2009 = vst [vmem:[#allocation56_spill] sm:$0xff] %v1581_v3  ;;  %2010 = vst [vmem:[#allocation57_spill] sm:$0xff] %v1584_v13  ;;  %v1592_v58 = vand.u32 2147483647, %v250_v31  ;;  %v585_v24 = vadd.f32 %v525_v38, %v404_v21  ;;  %v1594_v48 = vand.u32 2147483647, %v251_v30  ;;  %v526_v28 = vmul.f32 %v1488_v40, %v1488_v40 }
  0x7d   :  { %v584_v35 = vadd.f32 %v524_v6, %v403_v1  ;;  %v652_v25 = vadd.f32 %v651_v32, %v650_v43  ;;  %v254_v7 = vld [vmem:[#allocation6 + $0x10] sm:$0xff]  ;;  %v527_v14 = vmul.f32 %v1493_v12, %v1493_v12  ;;  %v528_v36 = vmul.f32 %v1498_v34, %v1498_v34  ;;  %v2014_v39 = vld [vmem:[#allocation14_spill] sm:$0xff]  ;;  %v255_v32 = vld [vmem:[#allocation6 + $0x18] sm:$0xff] }
  0x7e   :  { %2011 = vst [vmem:[#allocation61_spill] sm:$0xff] %v1592_v58  ;;  %2012 = vst [vmem:[#allocation62_spill] sm:$0xff] %v1594_v48  ;;  %v529_v60 = vmul.f32 %v1503_v55, %v1503_v55  ;;  %v530_v31 = vmul.f32 %v1508_v49, %v1508_v49  ;;  %v531_v21 = vmul.f32 %v1513_v15, %v1513_v15  ;;  %v655_v47 = vsel %vm614_vm1, %v585_v24, 0.0  ;;  %v2015_v43 = vld [vmem:[#allocation15_spill] sm:$0xff]  ;;  %v2023_v48 = vld [vmem:[#allocation21_spill] sm:$0xff] }
  0x7f   :  { %v653_v30 = vadd.f32 %v652_v25, %v583_v17  ;;  %v312_v1 = vsub.f32 %v252_v56, %v2013_v20  ;;  %v313_v0 = vsub.f32 %v253_v42, %v2014_v39  ;;  %v532_v38 = vmul.f32 %v1519_v9, %v1519_v9  ;;  %v257_v25 = vld [vmem:[#allocation6 + $0x28] sm:$0xff] }
  0x80   :  { %v1614_v6 = vmul.f32 %v1524_v16, %v1524_v16  ;;  %v314_v8 = vsub.f32 %v254_v7, %v2015_v43  ;;  %v534_v50 = vmul.f32 %v1530_v37, %v1530_v37  ;;  %v1622_v56 = vmul.f32 %v1535_v11, %v1535_v11  ;;  %v256_v43 = vld [vmem:[#allocation6 + $0x20] sm:$0xff] }
  0x81   :  { %v586_v17 = vadd.f32 %v526_v28, %v1488_v40  ;;  %v654_v42 = vadd.f32 %v653_v30, %v584_v35  ;;  %v1627_v20 = vmul.f32 %v1540_v53, %v1540_v53  ;;  %v1631_v24 = vmul.f32 %v1545_v62, %v1545_v62  ;;  %v2017_v30 = vld [vmem:[#allocation17_spill] sm:$0xff] }
  0x82   :  { %v587_v7 = vadd.f32 %v527_v14, %v1493_v12  ;;  %v588_v39 = vadd.f32 %v528_v36, %v1498_v34  ;;  %v315_v10 = vsub.f32 %v255_v32, %v2016_v54  ;;  %v432_v23 = vand.u32 2147483647, %v312_v1  ;;  %v2018_v14 = vld [vmem:[#allocation18_spill] sm:$0xff]  ;;  %v258_v32 = vld [vmem:[#allocation6 + $0x30] sm:$0xff] }
  0x83   :  { %v656_v22 = vadd.f32 %v655_v47, %v654_v42  ;;  %v433_v40 = vand.u32 2147483647, %v313_v0  ;;  %v1638_v28 = vmul.f32 %v1550_v18, %v1550_v18  ;;  %v1642_v35 = vmul.f32 %v1555_v59, %v1555_v59 }
  0x84   :  { %v317_v26 = vsub.f32 %v257_v25, %v2017_v30  ;;  %v434_v63 = vand.u32 2147483647, %v314_v8  ;;  %v1647_v12 = vmul.f32 %v1560_v2, %v1560_v2  ;;  %v1651_v34 = vmul.f32 %v1565_v57, %v1565_v57  ;;  %v259_v25 = vld [vmem:[#allocation6 + $0x38] sm:$0xff]  ;;  %v260_v30 = vld [vmem:[#allocation6 + $0x40] sm:$0xff] }
  0x85   :  { %v657_v54 = vadd.f32 %v656_v22, %v586_v17  ;;  %v316_v36 = vsub.f32 %v256_v43, %v2018_v14  ;;  %v1656_v1 = vmul.f32 %v1570_v29, %v1570_v29  ;;  %v1660_v0 = vmul.f32 %v1575_v45, %v1575_v45 }
  0x86   :  { %v589_v8 = vadd.f32 %v529_v60, %v1503_v55  ;;  %v659_v47 = vsel %vm614_vm1, %v588_v39, 0.0  ;;  %v435_v52 = vand.u32 2147483647, %v315_v10  ;;  %v706_v22 = vmul.f32 %v432_v23, %v432_v23  ;;  %v2019_v60 = vld [vmem:[#allocation19_spill] sm:$0xff] }
  0x87   :  { %v658_v42 = vadd.f32 %v657_v54, %v587_v7  ;;  %v707_v17 = vmul.f32 %v433_v40, %v433_v40  ;;  %v1666_v43 = vmul.f32 %v1577_v19, %v1577_v19  ;;  %v591_v14 = vadd.f32 %v531_v21, %v1513_v15  ;;  %v2022_v54 = vld [vmem:[#allocation20_spill] sm:$0xff]  ;;  %v261_v21 = vld [vmem:[#allocation6 + $0x48] sm:$0xff] }
  0x88   :  { %v437_v61 = vand.u32 2147483647, %v317_v26  ;;  %v708_v51 = vmul.f32 %v434_v63, %v434_v63  ;;  %v590_v46 = vadd.f32 %v530_v31, %v1508_v49  ;;  %v318_v39 = vsub.f32 %v258_v32, %v2019_v60 }
  0x89   :  { %v660_v55 = vadd.f32 %v659_v47, %v658_v42  ;;  %v436_v44 = vand.u32 2147483647, %v316_v36  ;;  %v1673_v7 = vmul.f32 %v1579_v4, %v1579_v4  ;;  %v1677_v10 = vmul.f32 %v1581_v3, %v1581_v3  ;;  %v262_v3 = vld [vmem:[#allocation6 + $0x50] sm:$0xff] }
  0x8a   :  { %v319_v33 = vsub.f32 %v259_v25, %v2022_v54  ;;  %v320_v15 = vsub.f32 %v260_v30, %v2023_v48  ;;  %v709_v58 = vmul.f32 %v435_v52, %v435_v52  ;;  %v766_v49 = vadd.f32 %v706_v22, %v432_v23  ;;  %v263_v25 = vld [vmem:[#allocation6 + $0x58] sm:$0xff] }
  0x8b   :  { %2020 = vst [vmem:[#allocation63_spill] sm:$0xff] %v1673_v7  ;;  %2021 = vst [vmem:[#allocation68_spill] sm:$0xff] %v1677_v10  ;;  %v661_v26 = vadd.f32 %v660_v55, %v589_v8  ;;  %v767_v31 = vadd.f32 %v707_v17, %v433_v40  ;;  %v1683_v36 = vmul.f32 %v1584_v13, %v1584_v13  ;;  %v663_v47 = vsel %vm614_vm1, %v591_v14, 0.0  ;;  %v2025_v40 = vld [vmem:[#allocation22_spill] sm:$0xff]  ;;  %v264_v13 = vld [vmem:[#allocation6 + $0x60] sm:$0xff] }
  0x8c   :  { %v711_v32 = vmul.f32 %v437_v61, %v437_v61  ;;  %v768_v42 = vadd.f32 %v708_v51, %v434_v63  ;;  %v592_v60 = vadd.f32 %v532_v38, %v1519_v9  ;;  %v438_v54 = vand.u32 2147483647, %v318_v39  ;;  %v2026_v51 = vld [vmem:[#allocation24_spill] sm:$0xff]  ;;  %v2027_v9 = vld [vmem:[#allocation23_spill] sm:$0xff] }
  0x8d   :  { %2024 = vst [vmem:[#allocation13_spill] sm:$0xff] %v1683_v36  ;;  %v662_v10 = vadd.f32 %v661_v26, %v590_v46  ;;  %v710_v48 = vmul.f32 %v436_v44, %v436_v44  ;;  %v593_v8 = vadd.f32 %v1614_v6, %v1524_v16  ;;  %v594_v23 = vadd.f32 %v534_v50, %v1530_v37 }
  0x8e   :  { %v321_v30 = vsub.f32 %v261_v21, %v2025_v40  ;;  %v440_v22 = vand.u32 2147483647, %v320_v15  ;;  %v439_v55 = vand.u32 2147483647, %v319_v33  ;;  %v769_v14 = vadd.f32 %v709_v58, %v435_v52 }
  0x8f   :  { %v664_v17 = vadd.f32 %v663_v47, %v662_v10  ;;  %v826_v36 = vadd.f32 %v767_v31, %v766_v49  ;;  %v322_v63 = vsub.f32 %v262_v3, %v2026_v51  ;;  %v323_v46 = vsub.f32 %v263_v25, %v2027_v9  ;;  %v265_v3 = vld [vmem:[#allocation6 + $0x68] sm:$0xff]  ;;  %v266_v10 = vld [vmem:[#allocation6 + $0x70] sm:$0xff]  ;;  %v268_v51 = vld [vmem:[#allocation6 + $0x80] sm:$0xff] }
  0x90   :  { %v771_v38 = vadd.f32 %v711_v32, %v437_v61  ;;  %v827_v39 = vsel %vm614_vm1, %v768_v42, 0.0  ;;  %v712_v7 = vmul.f32 %v438_v54, %v438_v54  ;;  %v770_v16 = vadd.f32 %v710_v48, %v436_v44  ;;  %v2028_v44 = vld [vmem:[#allocation25_spill] sm:$0xff]  ;;  %v2029_v42 = vld [vmem:[#allocation27_spill] sm:$0xff]  ;;  %v2030_v25 = vld [vmem:[#allocation26_spill] sm:$0xff] }
  0x91   :  { %v665_v26 = vadd.f32 %v664_v17, %v592_v60  ;;  %v828_v6 = vadd.f32 %v827_v39, %v826_v36  ;;  %v595_v37 = vadd.f32 %v1622_v56, %v1535_v11  ;;  %v596_v33 = vadd.f32 %v1627_v20, %v1540_v53 }
  0x92   :  { %v667_v52 = vsel %vm614_vm1, %v594_v23, 0.0  ;;  %v714_v58 = vmul.f32 %v440_v22, %v440_v22  ;;  %v441_v61 = vand.u32 2147483647, %v321_v30  ;;  %v713_v15 = vmul.f32 %v439_v55, %v439_v55 }
  0x93   :  { %v666_v50 = vadd.f32 %v665_v26, %v593_v8  ;;  %v829_v21 = vadd.f32 %v828_v6, %v769_v14  ;;  %v597_v49 = vadd.f32 %v1631_v24, %v1545_v62  ;;  %v324_v31 = vsub.f32 %v264_v13, %v2028_v44  ;;  %v267_v62 = vld [vmem:[#allocation6 + $0x78] sm:$0xff] }
  0x94   :  { %v443_v36 = vand.u32 2147483647, %v323_v46  ;;  %v831_v11 = vsel %vm614_vm1, %v771_v38, 0.0  ;;  %v442_v47 = vand.u32 2147483647, %v322_v63  ;;  %v772_v53 = vadd.f32 %v712_v7, %v438_v54  ;;  %v269_v63 = vld [vmem:[#allocation6 + $0x88] sm:$0xff] }
  0x95   :  { %v668_v56 = vadd.f32 %v667_v52, %v666_v50  ;;  %v830_v20 = vadd.f32 %v829_v21, %v770_v16  ;;  %v1705_v32 = vmul.f32 %v1586_v27, %v1586_v27  ;;  %v325_v60 = vsub.f32 %v265_v3, %v2029_v42  ;;  %v2033_v52 = vld [vmem:[#allocation29_spill] sm:$0xff] }
  0x96   :  { %v326_v48 = vsub.f32 %v266_v10, %v2030_v25  ;;  %v774_v8 = vadd.f32 %v714_v58, %v440_v22  ;;  %v715_v24 = vmul.f32 %v441_v61, %v441_v61  ;;  %v773_v13 = vadd.f32 %v713_v15, %v439_v55  ;;  %v2031_v55 = vld [vmem:[#allocation28_spill] sm:$0xff] }
  0x97   :  { %v669_v23 = vadd.f32 %v668_v56, %v595_v37  ;;  %v832_v40 = vadd.f32 %v831_v11, %v830_v20  ;;  %v598_v30 = vadd.f32 %v1638_v28, %v1550_v18  ;;  %v599_v7 = vadd.f32 %v1642_v35, %v1555_v59  ;;  %v2032_v37 = vld [vmem:[#allocation30_spill] sm:$0xff]  ;;  %v271_v11 = vld [vmem:[#allocation6 + $0x98] sm:$0xff]  ;;  %v272_v56 = vld [vmem:[#allocation6 + $0xa0] sm:$0xff] }
  0x98   :  { %v671_v54 = vsel %vm614_vm1, %v597_v49, 0.0  ;;  %v717_v17 = vmul.f32 %v443_v36, %v443_v36  ;;  %v444_v9 = vand.u32 2147483647, %v324_v31  ;;  %v716_v46 = vmul.f32 %v442_v47, %v442_v47 }
  0x99   :  { %v670_v14 = vadd.f32 %v669_v23, %v596_v33  ;;  %v833_v22 = vadd.f32 %v832_v40, %v772_v53  ;;  %v600_v38 = vadd.f32 %v1647_v12, %v1560_v2  ;;  %v327_v39 = vsub.f32 %v267_v62, %v2031_v55  ;;  %v270_v2 = vld [vmem:[#allocation6 + $0x90] sm:$0xff]  ;;  %v2035_v23 = vld [vmem:[#allocation33_spill] sm:$0xff] }
  0x9a   :  { %v446_v26 = vand.u32 2147483647, %v326_v48  ;;  %v835_v18 = vsel %vm614_vm1, %v774_v8, 0.0  ;;  %v445_v16 = vand.u32 2147483647, %v325_v60  ;;  %v775_v59 = vadd.f32 %v715_v24, %v441_v61  ;;  %v2036_v24 = vld [vmem:[#allocation32_spill] sm:$0xff] }
  0x9b   :  { %v672_v28 = vadd.f32 %v671_v54, %v670_v14  ;;  %v834_v35 = vadd.f32 %v833_v22, %v773_v13  ;;  %v1720_v6 = vmul.f32 %v1588_v41, %v1588_v41  ;;  %v328_v33 = vsub.f32 %v268_v51, %v2032_v37  ;;  %v2037_v14 = vld [vmem:[#allocation63_spill] sm:$0xff] }
  0x9c   :  { %v329_v58 = vsub.f32 %v269_v63, %v2033_v52  ;;  %v777_v50 = vadd.f32 %v717_v17, %v443_v36  ;;  %v718_v12 = vmul.f32 %v444_v9, %v444_v9  ;;  %v776_v10 = vadd.f32 %v716_v46, %v442_v47  ;;  %v2034_v47 = vld [vmem:[#allocation31_spill] sm:$0xff] }
  0x9d   :  { %v673_v3 = vadd.f32 %v672_v28, %v598_v30  ;;  %v836_v15 = vadd.f32 %v835_v18, %v834_v35  ;;  %v601_v21 = vadd.f32 %v1651_v34, %v1565_v57  ;;  %v602_v61 = vadd.f32 %v1656_v1, %v1570_v29  ;;  %v274_v22 = vld [vmem:[#allocation6 + $0xb0] sm:$0xff]  ;;  %v2038_v18 = vld [vmem:[#allocation56_spill] sm:$0xff] }
  0x9e   :  { %v675_v49 = vsel %vm614_vm1, %v600_v38, 0.0  ;;  %v720_v44 = vmul.f32 %v446_v26, %v446_v26  ;;  %v447_v53 = vand.u32 2147483647, %v327_v39  ;;  %v719_v20 = vmul.f32 %v445_v16, %v445_v16  ;;  %v275_v38 = vld [vmem:[#allocation6 + $0xb8] sm:$0xff] }
  0x9f   :  { %v674_v31 = vadd.f32 %v673_v3, %v599_v7  ;;  %v837_v36 = vadd.f32 %v836_v15, %v775_v59  ;;  %v603_v42 = vadd.f32 %v1660_v0, %v1575_v45  ;;  %v330_v60 = vsub.f32 %v270_v2, %v2034_v47  ;;  %v273_v45 = vld [vmem:[#allocation6 + $0xa8] sm:$0xff]  ;;  %v2039_v28 = vld [vmem:[#allocation68_spill] sm:$0xff]  ;;  %v2042_v3 = vld [vmem:[#allocation35_spill] sm:$0xff] }
  0xa0   :  { %v449_v25 = vand.u32 2147483647, %v329_v58  ;;  %v839_v57 = vsel %vm614_vm1, %v777_v50, 0.0  ;;  %v448_v48 = vand.u32 2147483647, %v328_v33  ;;  %v778_v29 = vadd.f32 %v718_v12, %v444_v9  ;;  %v2041_v58 = vld [vmem:[#allocation61_spill] sm:$0xff] }
  0xa1   :  { %v676_v34 = vadd.f32 %v675_v49, %v674_v31  ;;  %v838_v1 = vadd.f32 %v837_v36, %v776_v10  ;;  %v1735_v8 = vmul.f32 %v1590_v5, %v1590_v5  ;;  %v331_v62 = vsub.f32 %v271_v11, %v2035_v23  ;;  %v2043_v12 = vld [vmem:[#allocation36_spill] sm:$0xff]  ;;  %v2044_v11 = vld [vmem:[#allocation57_spill] sm:$0xff] }
  0xa2   :  { %v332_v13 = vsub.f32 %v272_v56, %v2036_v24  ;;  %v780_v40 = vadd.f32 %v720_v44, %v446_v26  ;;  %v721_v0 = vmul.f32 %v447_v53, %v447_v53  ;;  %v779_v7 = vadd.f32 %v719_v20, %v445_v16  ;;  %v2040_v16 = vld [vmem:[#allocation34_spill] sm:$0xff]  ;;  %v2045_v56 = vld [vmem:[#allocation13_spill] sm:$0xff] }
  0xa3   :  { %v677_v30 = vadd.f32 %v676_v34, %v601_v21  ;;  %v840_v54 = vadd.f32 %v839_v57, %v838_v1  ;;  %v604_v17 = vadd.f32 %v1666_v43, %v1577_v19  ;;  %v605_v51 = vadd.f32 %v2037_v14, %v1579_v4  ;;  %v278_v57 = vld [vmem:[#allocation6 + $0xd0] sm:$0xff] }
  0xa4   :  { %v679_v63 = vsel %vm614_vm1, %v603_v42, 0.0  ;;  %v723_v9 = vmul.f32 %v449_v25, %v449_v25  ;;  %v450_v55 = vand.u32 2147483647, %v330_v60  ;;  %v722_v39 = vmul.f32 %v448_v48, %v448_v48  ;;  %v277_v60 = vld [vmem:[#allocation6 + $0xc8] sm:$0xff] }
  0xa5   :  { %v678_v46 = vadd.f32 %v677_v30, %v602_v61  ;;  %v841_v26 = vadd.f32 %v840_v54, %v778_v29  ;;  %v606_v59 = vadd.f32 %v2039_v28, %v2038_v18  ;;  %v333_v35 = vsub.f32 %v273_v45, %v2040_v16  ;;  %v276_v61 = vld [vmem:[#allocation6 + $0xc0] sm:$0xff]  ;;  %v2047_v30 = vld [vmem:[#allocation62_spill] sm:$0xff]  ;;  %v2049_v54 = vld [vmem:[#allocation39_spill] sm:$0xff] }
  0xa6   :  { %v452_v37 = vand.u32 2147483647, %v332_v13  ;;  %v843_v19 = vsel %vm614_vm1, %v780_v40, 0.0  ;;  %v451_v33 = vand.u32 2147483647, %v331_v62  ;;  %v781_v4 = vadd.f32 %v721_v0, %v447_v53  ;;  %v2048_v0 = vld [vmem:[#allocation38_spill] sm:$0xff] }
  0xa7   :  { %v680_v43 = vadd.f32 %v679_v63, %v678_v46  ;;  %v842_v52 = vadd.f32 %v841_v26, %v779_v7  ;;  %v551_v50 = vmul.f32 %v2041_v58, %v2041_v58  ;;  %v334_v2 = vsub.f32 %v274_v22, %v2042_v3  ;;  %v279_v63 = vld [vmem:[#allocation6 + $0xd8] sm:$0xff]  ;;  %v280_v26 = vld [vmem:[#allocation6 + $0xe0] sm:$0xff]  ;;  %v281_v18 = vld [vmem:[#allocation6 + $0xe8] sm:$0xff] }
  0xa8   :  { %v335_v10 = vsub.f32 %v275_v38, %v2043_v12  ;;  %v783_v15 = vadd.f32 %v723_v9, %v449_v25  ;;  %v724_v49 = vmul.f32 %v450_v55, %v450_v55  ;;  %v782_v44 = vadd.f32 %v722_v39, %v448_v48  ;;  %v2046_v48 = vld [vmem:[#allocation37_spill] sm:$0xff]  ;;  %v2052_v3 = vld [vmem:[#allocation42_spill] sm:$0xff] }
  0xa9   :  { %v681_v21 = vadd.f32 %v680_v43, %v604_v17  ;;  %v844_v31 = vadd.f32 %v843_v19, %v842_v52  ;;  %v607_v20 = vadd.f32 %v2045_v56, %v2044_v11  ;;  %v608_v53 = vadd.f32 %v1705_v32, %v1586_v27  ;;  %v284_v56 = vld [vmem:[#allocation6 + $0x100] sm:$0xff] }
  0xaa   :  { %v683_v36 = vsel %vm614_vm1, %v606_v59, 0.0  ;;  %v726_v42 = vmul.f32 %v452_v37, %v452_v37  ;;  %v453_v34 = vand.u32 2147483647, %v333_v35  ;;  %v725_v29 = vmul.f32 %v451_v33, %v451_v33 }
  0xab   :  { %v682_v47 = vadd.f32 %v681_v21, %v605_v51  ;;  %v845_v25 = vadd.f32 %v844_v31, %v781_v4  ;;  %v609_v1 = vadd.f32 %v1720_v6, %v1588_v41  ;;  %v336_v23 = vsub.f32 %v276_v61, %v2046_v48 }
  0xac   :  { %v455_v62 = vand.u32 2147483647, %v335_v10  ;;  %v847_v24 = vsel %vm614_vm1, %v783_v15, 0.0  ;;  %v454_v40 = vand.u32 2147483647, %v334_v2  ;;  %v784_v27 = vadd.f32 %v724_v49, %v450_v55  ;;  %v282_v15 = vld [vmem:[#allocation6 + $0xf0] sm:$0xff] }
  0xad   :  { %v684_v13 = vadd.f32 %v683_v36, %v682_v47  ;;  %v846_v32 = vadd.f32 %v845_v25, %v782_v44  ;;  %v552_v45 = vmul.f32 %v2047_v30, %v2047_v30  ;;  %v337_v7 = vsub.f32 %v277_v60, %v2048_v0  ;;  %v2053_v47 = vld [vmem:[#allocation43_spill] sm:$0xff] }
  0xae   :  { %v338_v17 = vsub.f32 %v278_v57, %v2049_v54  ;;  %v786_v14 = vadd.f32 %v726_v42, %v452_v37  ;;  %v727_v41 = vmul.f32 %v453_v34, %v453_v34  ;;  %v785_v6 = vadd.f32 %v725_v29, %v451_v33  ;;  %v2050_v37 = vld [vmem:[#allocation40_spill] sm:$0xff] }
  0xaf   :  { %v685_v51 = vadd.f32 %v684_v13, %v607_v20  ;;  %v848_v9 = vadd.f32 %v847_v24, %v846_v32  ;;  %v610_v46 = vadd.f32 %v1735_v8, %v1590_v5  ;;  %v611_v22 = vadd.f32 %v551_v50, %v2041_v58  ;;  %v2051_v58 = vld [vmem:[#allocation41_spill] sm:$0xff]  ;;  %v283_v42 = vld [vmem:[#allocation6 + $0xf8] sm:$0xff] }
  0xb0   :  { %v687_v38 = vsel %vm614_vm1, %v609_v1, 0.0  ;;  %v729_v55 = vmul.f32 %v455_v62, %v455_v62  ;;  %v456_v28 = vand.u32 2147483647, %v336_v23  ;;  %v728_v59 = vmul.f32 %v454_v40, %v454_v40  ;;  %v2054_v23 = vld [vmem:[#allocation45_spill] sm:$0xff]  ;;  %v2055_v13 = vld [vmem:[#allocation44_spill] sm:$0xff] }
  0xb1   :  { %v686_v39 = vadd.f32 %v685_v51, %v608_v53  ;;  %v849_v16 = vadd.f32 %v848_v9, %v784_v27  ;;  %v612_v35 = vadd.f32 %v552_v45, %v2047_v30  ;;  %v339_v19 = vsub.f32 %v279_v63, %v2050_v37  ;;  %v285_v45 = vld [vmem:[#allocation6 + $0x108] sm:$0xff]  ;;  %v286_v51 = vld [vmem:[#allocation6 + $0x110] sm:$0xff]  ;;  %v288_v37 = vld [vmem:[#allocation6 + $0x120] sm:$0xff] }
  0xb2   :  { %v458_v43 = vand.u32 2147483647, %v338_v17  ;;  %v851_v33 = vsel %vm614_vm1, %v786_v14, 0.0  ;;  %v457_v5 = vand.u32 2147483647, %v337_v7  ;;  %v787_v8 = vadd.f32 %v727_v41, %v453_v34  ;;  %v287_v7 = vld [vmem:[#allocation6 + $0x118] sm:$0xff] }
  0xb3   :  { %v688_v4 = vadd.f32 %v687_v38, %v686_v39  ;;  %v850_v52 = vadd.f32 %v849_v16, %v785_v6  ;;  %v340_v50 = vsub.f32 %v280_v26, %v2051_v58  ;;  %v341_v2 = vsub.f32 %v281_v18, %v2052_v3  ;;  %v2056_v6 = vld [vmem:[#allocation46_spill] sm:$0xff]  ;;  %v2058_v18 = vld [vmem:[#allocation47_spill] sm:$0xff] }
  0xb4   :  { %v789_v12 = vadd.f32 %v729_v55, %v455_v62  ;;  %v730_v21 = vmul.f32 %v456_v28, %v456_v28  ;;  %v788_v61 = vadd.f32 %v728_v59, %v454_v40  ;;  %v691_v44 = vsel %vm614_vm1, %v612_v35, 0.0  ;;  %v2057_v55 = vld [vmem:[#allocation48_spill] sm:$0xff] }
  0xb5   :  { %v689_v10 = vadd.f32 %v688_v4, %v610_v46  ;;  %v852_v49 = vadd.f32 %v851_v33, %v850_v52  ;;  %v732_v31 = vmul.f32 %v458_v43, %v458_v43  ;;  %v459_v20 = vand.u32 2147483647, %v339_v19 }
  0xb6   :  { %v731_v53 = vmul.f32 %v457_v5, %v457_v5  ;;  %v342_v60 = vsub.f32 %v282_v15, %v2053_v47  ;;  %v461_v57 = vand.u32 2147483647, %v341_v2  ;;  %v855_v34 = vsel %vm614_vm1, %v789_v12, 0.0  ;;  %v2060_v15 = vld [vmem:[#allocation51_spill] sm:$0xff] }
  0xb7   :  { %v690_v11 = vadd.f32 %v689_v10, %v611_v22  ;;  %v853_v36 = vadd.f32 %v852_v49, %v787_v8  ;;  %v460_v25 = vand.u32 2147483647, %v340_v50  ;;  %v790_v1 = vadd.f32 %v730_v21, %v456_v28  ;;  %v289_v8 = vld [vmem:[#allocation6 + $0x128] sm:$0xff]  ;;  %v2059_v50 = vld [vmem:[#allocation49_spill] sm:$0xff] }
  0xb8   :  { %v344_v62 = vsub.f32 %v284_v56, %v2054_v23  ;;  %v792_v24 = vadd.f32 %v732_v31, %v458_v43  ;;  %v343_v40 = vsub.f32 %v283_v42, %v2055_v13  ;;  %v733_v27 = vmul.f32 %v459_v20, %v459_v20  ;;  %v290_v43 = vld [vmem:[#allocation6 + $0x130] sm:$0xff]  ;;  %v2061_v49 = vld [vmem:[#allocation50_spill] sm:$0xff] }
  0xb9   :  { %v692_v29 = vadd.f32 %v691_v44, %v690_v11  ;;  %v854_v48 = vadd.f32 %v853_v36, %v788_v61  ;;  %v791_v32 = vadd.f32 %v731_v53, %v457_v5  ;;  %v735_v0 = vmul.f32 %v461_v57, %v461_v57  ;;  %v293_v36 = vld [vmem:[#allocation6 + $0x148] sm:$0xff] }
  0xba   :  { %v462_v54 = vand.u32 2147483647, %v342_v60  ;;  %v734_v17 = vmul.f32 %v460_v25, %v460_v25  ;;  %v464_v63 = vand.u32 2147483647, %v344_v62  ;;  %v859_v41 = vsel %vm614_vm1, %v792_v24, 0.0  ;;  %v2063_v24 = vld [vmem:[#allocation54_spill] sm:$0xff] }
  0xbb   :  { %693 = vadd.xlane.f32.xlu0 %v692_v29  ;;  %v856_v30 = vadd.f32 %v855_v34, %v854_v48  ;;  %v345_v9 = vsub.f32 %v285_v45, %v2056_v6  ;;  %v463_v46 = vand.u32 2147483647, %v343_v40  ;;  %v793_v22 = vadd.f32 %v733_v27, %v459_v20  ;;  %v291_v20 = vld [vmem:[#allocation6 + $0x138] sm:$0xff]  ;;  %v2064_v27 = vld [vmem:[#allocation53_spill] sm:$0xff] }
  0xbc   :  { %v347_v39 = vsub.f32 %v287_v7, %v2057_v55  ;;  %v795_v26 = vadd.f32 %v735_v0, %v461_v57  ;;  %v346_v28 = vsub.f32 %v286_v51, %v2058_v18  ;;  %v736_v59 = vmul.f32 %v462_v54, %v462_v54  ;;  %v292_v57 = vld [vmem:[#allocation6 + $0x140] sm:$0xff]  ;;  %v294_v7 = vld [vmem:[#allocation6 + $0x150] sm:$0xff] }
  0xbd   :  { %v857_v14 = vadd.f32 %v856_v30, %v790_v1  ;;  %v794_v16 = vadd.f32 %v734_v17, %v460_v25  ;;  %v738_v19 = vmul.f32 %v464_v63, %v464_v63  ;;  %v465_v33 = vand.u32 2147483647, %v345_v9  ;;  %v2062_v25 = vld [vmem:[#allocation52_spill] sm:$0xff]  ;;  %v296_v17 = vld [vmem:[#allocation6 + $0x160] sm:$0xff] }
  0xbe   :  { %v737_v4 = vmul.f32 %v463_v46, %v463_v46  ;;  %v467_v52 = vand.u32 2147483647, %v347_v39  ;;  %v863_v58 = vsel %vm614_vm1, %v795_v26, 0.0  ;;  %v348_v3 = vsub.f32 %v288_v37, %v2059_v50  ;;  %v2066_v26 = vld [vmem:[#allocation59_spill] sm:$0xff] }
  0xbf   :  { %v858_v38 = vadd.f32 %v857_v14, %v791_v32  ;;  %v466_v2 = vand.u32 2147483647, %v346_v28  ;;  %v796_v12 = vadd.f32 %v736_v59, %v462_v54  ;;  %v350_v21 = vsub.f32 %v290_v43, %v2060_v15  ;;  %v2067_v59 = vld [vmem:[#allocation58_spill] sm:$0xff] }
  0xc0   :  { %v798_v61 = vadd.f32 %v738_v19, %v464_v63  ;;  %v349_v44 = vsub.f32 %v289_v8, %v2061_v49  ;;  %v739_v31 = vmul.f32 %v465_v33, %v465_v33  ;;  %v797_v11 = vadd.f32 %v737_v4, %v463_v46  ;;  %v2065_v46 = vld [vmem:[#allocation55_spill] sm:$0xff]  ;;  %v297_v43 = vld [vmem:[#allocation6 + $0x168] sm:$0xff]  ;;  %v299_v4 = vld [vmem:[#allocation6 + $0x178] sm:$0xff] }
  0xc1   :  { %v860_v35 = vadd.f32 %v859_v41, %v858_v38  ;;  %v741_v53 = vmul.f32 %v467_v52, %v467_v52  ;;  %v468_v42 = vand.u32 2147483647, %v348_v3  ;;  %v740_v47 = vmul.f32 %v466_v2, %v466_v2  ;;  %v295_v41 = vld [vmem:[#allocation6 + $0x158] sm:$0xff] }
  0xc2   :  { %v470_v34 = vand.u32 2147483647, %v350_v21  ;;  %v867_v29 = vsel %vm614_vm1, %v798_v61, 0.0  ;;  %v351_v1 = vsub.f32 %v291_v20, %v2062_v25  ;;  %v469_v48 = vand.u32 2147483647, %v349_v44  ;;  %v2069_v61 = vld [vmem:[#allocation65_spill] sm:$0xff] }
  0xc3   :  { %v861_v5 = vadd.f32 %v860_v35, %v793_v22  ;;  %v799_v23 = vadd.f32 %v739_v31, %v465_v33  ;;  %v353_v13 = vsub.f32 %v293_v36, %v2063_v24  ;;  %v801_v40 = vadd.f32 %v741_v53, %v467_v52  ;;  %v2070_v31 = vld [vmem:[#allocation64_spill] sm:$0xff]  ;;  %v300_v36 = vld [vmem:[#allocation6 + $0x180] sm:$0xff] }
  0xc4   :  { %v352_v32 = vsub.f32 %v292_v57, %v2064_v27  ;;  %v742_v30 = vmul.f32 %v468_v42, %v468_v42  ;;  %v800_v45 = vadd.f32 %v740_v47, %v466_v2  ;;  %v744_v54 = vmul.f32 %v470_v34, %v470_v34  ;;  %v2068_v2 = vld [vmem:[#allocation60_spill] sm:$0xff]  ;;  %v302_v47 = vld [vmem:[#allocation6 + $0x190] sm:$0xff] }
  0xc5   :  { %v862_v10 = vadd.f32 %v861_v5, %v794_v16  ;;  %v471_v14 = vand.u32 2147483647, %v351_v1  ;;  %v743_v51 = vmul.f32 %v469_v48, %v469_v48  ;;  %v473_v6 = vand.u32 2147483647, %v353_v13 }
  0xc6   :  { %v871_v9 = vsel %vm614_vm1, %v801_v40, 0.0  ;;  %v354_v22 = vsub.f32 %v294_v7, %v2065_v46  ;;  %v472_v38 = vand.u32 2147483647, %v352_v32  ;;  %v802_v55 = vadd.f32 %v742_v30, %v468_v42  ;;  %v2072_v40 = vld [vmem:[#allocation69_spill] sm:$0xff]  ;;  %v2073_v30 = vld [vmem:[#allocation67_spill] sm:$0xff] }
  0xc7   :  { %v864_v56 = vadd.f32 %v863_v58, %v862_v10  ;;  %v356_v18 = vsub.f32 %v296_v17, %v2066_v26  ;;  %v804_v28 = vadd.f32 %v744_v54, %v470_v34  ;;  %v355_v16 = vsub.f32 %v295_v41, %v2067_v59  ;;  %v298_v58 = vld [vmem:[#allocation6 + $0x170] sm:$0xff]  ;;  %v303_v17 = vld [vmem:[#allocation6 + $0x198] sm:$0xff] }
  0xc8   :  { %v745_v35 = vmul.f32 %v471_v14, %v471_v14  ;;  %v803_v37 = vadd.f32 %v743_v51, %v469_v48  ;;  %v747_v33 = vmul.f32 %v473_v6, %v473_v6  ;;  %v474_v5 = vand.u32 2147483647, %v354_v22  ;;  %v2071_v48 = vld [vmem:[#allocation66_spill] sm:$0xff] }
  0xc9   :  { %v865_v60 = vadd.f32 %v864_v56, %v796_v12  ;;  %v746_v8 = vmul.f32 %v472_v38, %v472_v38  ;;  %v476_v50 = vand.u32 2147483647, %v356_v18  ;;  %v875_v3 = vsel %vm614_vm1, %v804_v28, 0.0  ;;  %v305_v51 = vld [vmem:[#allocation6 + $0x1a8] sm:$0xff] }
  0xca   :  { %v357_v12 = vsub.f32 %v297_v43, %v2068_v2  ;;  %v475_v10 = vand.u32 2147483647, %v355_v16  ;;  %v805_v15 = vadd.f32 %v745_v35, %v471_v14  ;;  %v359_v49 = vsub.f32 %v299_v4, %v2069_v61  ;;  %v2074_v28 = vld [vmem:[#allocation70_spill] sm:$0xff]  ;;  %v976_v35 = vld [vmem:[#allocation8 + $0x1a0] sm:$0xff]  ;;  %v306_v4 = vld [vmem:[#allocation6 + $0x1b0] sm:$0xff] }
  0xcb   :  { %v866_v62 = vadd.f32 %v865_v60, %v797_v11  ;;  %v807_v44 = vadd.f32 %v747_v33, %v473_v6  ;;  %v358_v11 = vsub.f32 %v298_v58, %v2070_v31  ;;  %v748_v56 = vmul.f32 %v474_v5, %v474_v5 }
  0xcc   :  { %v806_v20 = vadd.f32 %v746_v8, %v472_v38  ;;  %v750_v42 = vmul.f32 %v476_v50, %v476_v50  ;;  %v477_v60 = vand.u32 2147483647, %v357_v12  ;;  %v749_v57 = vmul.f32 %v475_v10, %v475_v10  ;;  %v975_v38 = vld [vmem:[#allocation8 + $0x198] sm:$0xff]  ;;  %v308_v8 = vld [vmem:[#allocation6 + $0x1c0] sm:$0xff] }
  0xcd   :  { %v868_v0 = vadd.f32 %v867_v29, %v866_v62  ;;  %v301_v29 = vld [vmem:[#allocation6 + $0x188] sm:$0xff]  ;;  %v479_v25 = vand.u32 2147483647, %v359_v49  ;;  %v879_v1 = vsel %vm614_vm1, %v807_v44, 0.0  ;;  %v478_v62 = vand.u32 2147483647, %v358_v11 }
  0xce   :  { %v808_v24 = vadd.f32 %v748_v56, %v474_v5  ;;  %v362_v27 = vsub.f32 %v302_v47, %v2072_v40  ;;  %v810_v32 = vadd.f32 %v750_v42, %v476_v50  ;;  %v809_v7 = vadd.f32 %v749_v57, %v475_v10  ;;  %v977_v10 = vld [vmem:[#allocation8 + $0x1b0] sm:$0xff]  ;;  %v978_v56 = vld [vmem:[#allocation8 + $0x1b8] sm:$0xff]  ;;  %v309_v47 = vld [vmem:[#allocation6 + $0x1c8] sm:$0xff] }
  0xcf   :  { %v869_v63 = vadd.f32 %v868_v0, %v799_v23  ;;  %v360_v23 = vsub.f32 %v300_v36, %v2071_v48  ;;  %v751_v0 = vmul.f32 %v477_v60, %v477_v60  ;;  %v753_v14 = vmul.f32 %v479_v25, %v479_v25  ;;  %v2075_v44 = vld [vmem:[#allocation71_spill] sm:$0xff]  ;;  %v311_v57 = vld [vmem:[#allocation6 + $0x1d8] sm:$0xff] }
  0xd0   :  { %v752_v41 = vmul.f32 %v478_v62, %v478_v62  ;;  %v482_v46 = vand.u32 2147483647, %v362_v27  ;;  %v883_v22 = vsel %vm614_vm1, %v810_v32, 0.0  ;;  %v365_v59 = vsub.f32 %v305_v51, %v2074_v28  ;;  %v2076_v32 = vld [vmem:[#allocation72_spill] sm:$0xff] }
  0xd1   :  { %v870_v39 = vadd.f32 %v869_v63, %v800_v45  ;;  %v361_v45 = vsub.f32 %v301_v29, %v2073_v30  ;;  %v480_v63 = vand.u32 2147483647, %v360_v23  ;;  %v811_v26 = vadd.f32 %v751_v0, %v477_v60  ;;  %v980_v0 = vld [vmem:[#allocation8 + $0x1d0] sm:$0xff] }
  0xd2   :  { %v813_v16 = vadd.f32 %v753_v14, %v479_v25  ;;  %v812_v43 = vadd.f32 %v752_v41, %v478_v62  ;;  %v756_v5 = vmul.f32 %v482_v46, %v482_v46  ;;  %v485_v2 = vand.u32 2147483647, %v365_v59  ;;  %v979_v62 = vld [vmem:[#allocation8 + $0x1c8] sm:$0xff] }
  0xd3   :  { %v872_v19 = vadd.f32 %v871_v9, %v870_v39  ;;  %v304_v9 = vld [vmem:[#allocation6 + $0x1a0] sm:$0xff]  ;;  %v481_v39 = vand.u32 2147483647, %v361_v45  ;;  %v368_v31 = vsub.f32 %v308_v8, %v2075_v44  ;;  %v371_v30 = vsub.f32 %v311_v57, %v2076_v32 }
  0xd4   :  { %v887_v12 = vsel %vm614_vm1, %v813_v16, 0.0  ;;  %v816_v11 = vadd.f32 %v756_v5, %v482_v46  ;;  %v759_v60 = vmul.f32 %v485_v2, %v485_v2 }
  0xd5   :  { %v873_v52 = vadd.f32 %v872_v19, %v802_v55  ;;  %v363_v55 = vsub.f32 %v303_v17, %v975_v38  ;;  %v754_v19 = vmul.f32 %v480_v63, %v480_v63  ;;  %v755_v58 = vmul.f32 %v481_v39, %v481_v39 }
  0xd6   :  { %v488_v48 = vand.u32 2147483647, %v368_v31  ;;  %v891_v23 = vsel %vm614_vm1, %v816_v11, 0.0  ;;  %v819_v45 = vadd.f32 %v759_v60, %v485_v2 }
  0xd7   :  { %v874_v21 = vadd.f32 %v873_v52, %v803_v37  ;;  %v364_v37 = vsub.f32 %v304_v9, %v976_v35  ;;  %v483_v52 = vand.u32 2147483647, %v363_v55  ;;  %v814_v61 = vadd.f32 %v754_v19, %v480_v63 }
  0xd8   :  { %v815_v36 = vadd.f32 %v755_v58, %v481_v39  ;;  %v762_v51 = vmul.f32 %v488_v48, %v488_v48  ;;  %v491_v9 = vand.u32 2147483647, %v371_v30  ;;  %v895_v46 = vsel %vm614_vm1, %v819_v45, 0.0 }
  0xd9   :  { %v876_v53 = vadd.f32 %v875_v3, %v874_v21  ;;  %v307_v3 = vld [vmem:[#allocation6 + $0x1b8] sm:$0xff]  ;;  %v484_v21 = vand.u32 2147483647, %v364_v37 }
  0xda   :  { %v822_v39 = vadd.f32 %v762_v51, %v488_v48  ;;  %v765_v59 = vmul.f32 %v491_v9, %v491_v9 }
  0xdb   :  { %v877_v34 = vadd.f32 %v876_v53, %v805_v15  ;;  %v366_v15 = vsub.f32 %v306_v4, %v977_v10  ;;  %v757_v53 = vmul.f32 %v483_v52, %v483_v52  ;;  %v758_v29 = vmul.f32 %v484_v21, %v484_v21 }
  0xdc   :  { %v899_v37 = vsel %vm614_vm1, %v822_v39, 0.0 }
  0xdd   :  { %v878_v13 = vadd.f32 %v877_v34, %v806_v20  ;;  %v367_v20 = vsub.f32 %v307_v3, %v978_v56  ;;  %v486_v34 = vand.u32 2147483647, %v366_v15  ;;  %v817_v40 = vadd.f32 %v757_v53, %v483_v52 }
  0xde   :  { %v818_v17 = vadd.f32 %v758_v29, %v484_v21 }
  0xdf   :  { %v880_v54 = vadd.f32 %v879_v1, %v878_v13  ;;  %v310_v1 = vld [vmem:[#allocation6 + $0x1d0] sm:$0xff]  ;;  %v487_v13 = vand.u32 2147483647, %v367_v20 }
  0xe1   :  { %v881_v6 = vadd.f32 %v880_v54, %v808_v24  ;;  %v369_v24 = vsub.f32 %v309_v47, %v979_v62  ;;  %v760_v54 = vmul.f32 %v486_v34, %v486_v34  ;;  %v761_v41 = vmul.f32 %v487_v13, %v487_v13 }
  0xe3   :  { %v882_v18 = vadd.f32 %v881_v6, %v809_v7  ;;  %v370_v7 = vsub.f32 %v310_v1, %v980_v0  ;;  %v489_v63 = vand.u32 2147483647, %v369_v24  ;;  %v820_v38 = vadd.f32 %v760_v54, %v486_v34 }
  0xe5   :  { %v884_v33 = vadd.f32 %v883_v22, %v882_v18  ;;  %v490_v22 = vand.u32 2147483647, %v370_v7  ;;  %v821_v18 = vadd.f32 %v761_v41, %v487_v13 }
  0xe7   :  { %v885_v50 = vadd.f32 %v884_v33, %v811_v26  ;;  %v763_v26 = vmul.f32 %v489_v63, %v489_v63  ;;  %v764_v16 = vmul.f32 %v490_v22, %v490_v22  ;;  %v825_v33 = vadd.f32 %v765_v59, %v491_v9 }
  0xe9   :  { %v886_v49 = vadd.f32 %v885_v50, %v812_v43  ;;  %v823_v19 = vadd.f32 %v763_v26, %v489_v63  ;;  %v824_v4 = vadd.f32 %v764_v16, %v490_v22  ;;  %v903_v52 = vsel %vm614_vm1, %v825_v33, 0.0 }
  0xeb   :  { %v888_v42 = vadd.f32 %v887_v12, %v886_v49  ;;  %v935_v49 = vpop.xlane.xlu1 %934 }
  0xec   :  { %v936_v44 = vrot.slane %v935_v49, 4 }
  0xed   :  { %v889_v25 = vadd.f32 %v888_v42, %v814_v61 }
  0xee   :  { %v937_v31 = vadd.f32 %v936_v44, %v935_v49 }
  0xef   :  { %v890_v27 = vadd.f32 %v889_v25, %v815_v36 }
  0xf0   :  { %v938_v11 = vrot.slane %v937_v31, 2 }
  0xf1   :  { %v892_v14 = vadd.f32 %v891_v23, %v890_v27 }
  0xf2   :  { %v939_v36 = vadd.f32 %v938_v11, %v937_v31 }
  0xf3   :  { %v893_v6 = vadd.f32 %v892_v14, %v817_v40 }
  0xf4   :  { %v940_v60 = vrot.slane %v939_v36, 1 }
  0xf5   :  { %v894_v55 = vadd.f32 %v893_v6, %v818_v17 }
  0xf6   :  { %v941_v29 = vadd.f32 %v940_v60, %v939_v36 }
  0xf7   :  { %v896_v28 = vadd.f32 %v895_v46, %v894_v55 }
  0xf9   :  { %v897_v35 = vadd.f32 %v896_v28, %v820_v38 }
  0xfb   :  { %v898_v43 = vadd.f32 %v897_v35, %v821_v18 }
  0xfd   :  { %v900_v5 = vadd.f32 %v899_v37, %v898_v43 }
  0xff   :  { %v901_v8 = vadd.f32 %v900_v5, %v823_v19 }
 0x101   :  { %v902_v58 = vadd.f32 %v901_v8, %v824_v4 }
 0x103   :  { %v904_v50 = vadd.f32 %v903_v52, %v902_v58 }
 0x105   :  { %905 = vadd.xlane.f32.xlu0 %v904_v50 }
 0x148   :  { %v694_v3 = vpop.xlane.xlu0 %693 }
 0x149   :  { %v695_v2 = vrot.slane %v694_v3, 4 }
 0x14b   :  { %v696_v12 = vadd.f32 %v695_v2, %v694_v3 }
 0x14d   :  { %v697_v10 = vrot.slane %v696_v12, 2 }
 0x14f   :  { %v698_v15 = vadd.f32 %v697_v10, %v696_v12 }
 0x151   :  { %v699_v21 = vrot.slane %v698_v15, 1 }
 0x153   :  { %v700_v61 = vadd.f32 %v699_v21, %v698_v15 }
 0x155   :  { %963 = vpush %v700_v61 }
 0x186   :  { %s964_s2 = spop %963 }
 0x187   :  { %s920_s3 = smul.f32 2.0833333e-05, %s964_s2 }
 0x189   :  { %922 = sst [smem:[#allocation9]] %s920_s3 }
 0x192   :  { %v906_v56 = vpop.xlane.xlu0 %905 }
 0x193   :  { %v907_v20 = vrot.slane %v906_v56, 4 }
 0x195   :  { %v908_v53 = vadd.f32 %v907_v20, %v906_v56 }
 0x197   :  { %v909_v42 = vrot.slane %v908_v53, 2 }
 0x199   :  { %v910_v47 = vadd.f32 %v909_v42, %v908_v53 }
 0x19b   :  { %v911_v57 = vrot.slane %v910_v47, 1 }
 0x19d   :  { %v912_v34 = vadd.f32 %v911_v57, %v910_v47 }
 0x19f   :  { %965 = vpush %v912_v34 }
 0x1a0   :  { %967 = vpush %v941_v29 }
 0x1d0   :  { %s966_s4 = spop %965 }
 0x1d1   :  { %s924_s30 = smul.f32 2.0833333e-05, %s966_s4  ;;  %s968_s6 = spop %967 }
 0x1d2   :  { %s943_s10 = smul.f32 0.041666668, %s968_s6 }
 0x1d3   :  { %926 = sst [smem:[#allocation9 + $0x1]] %s924_s30 }
 0x1d4   :  { %945 = sst [smem:[#allocation9 + $0x2]] %s943_s10 }
 0x1d5   :  { %1056 = shalt.err (!%p1053_p12)
}
 0x1d6   :  { %s1068_s17 = smov [#allocation9]  }
 0x1d7   :  { %953 = dma.smem_to_hbm %s1068_s17, 16, %s1829_s5, [#allocation5]  }
 0x1d8   :  { %1061 = dma.done.wait [#allocation5], 16  }
 0x1d9   :  { %1062 = vsyncadd [#allocation5], 4294967280 }
 0x1da   :  { %957 = sfence }
 0x1db   :  { %958 = vsyncpa [#allocation4], 1 }
 0x1dc   :  { %959 = vsyncpa [#allocation7], 1 }
 0x1dd   :  { %960 = vsyncpa [#allocation5], 1 }

</bundles_post_ra>
